<compile_context>
chip_gen: v7x
topology: tpu7x:2x2x1
jax: 0.10.0
libtpu: 0.0.40
codegen_flags: <defaults>
</compile_context>

<pallas_src>
import jax
import jax.numpy as jnp
from jax import lax
from jax.experimental import pallas as pl
from jax.experimental.pallas import tpu as pltpu

NEG_SLOPE = 0.01  # PyTorch nn.LeakyReLU default


def _leaky(y):
    return jnp.where(y > 0, y, NEG_SLOPE * y)


def _round_up(x, m):
    return (x + m - 1) // m * m


def _pad2(a, rows, cols, dtype=jnp.float32):
    r, c = a.shape
    return jnp.pad(a.astype(jnp.float32), ((0, rows - r), (0, cols - c))).astype(dtype)


# ----------------------------------------------------------------------------
# Fused Pallas kernel: x -> 7 chained (matmul + bias [+ LeakyReLU]) layers.
#   refs = (x_ref, w1, b1, ..., w7, b7, o_ref).  All weight/bias tiles are
#   zero-padded to lane-aligned shapes, which is mathematically inert through
#   matmul, bias add and LeakyReLU (leaky(0) == 0).  Weights may be bf16;
#   activations, accumulation, bias add and LeakyReLU stay in f32.
# ----------------------------------------------------------------------------
def _fused_forward_kernel(x_ref, *refs):
    o_ref = refs[-1]
    wb = refs[:-1]
    n_layers = len(wb) // 2
    h = x_ref[...]                                        # f32 activations
    for li in range(n_layers):
        w = wb[2 * li][...]                               # bf16 (or f32) weights
        b = wb[2 * li + 1][...]                           # f32 bias row
        h = jnp.dot(h.astype(w.dtype), w,
                    preferred_element_type=jnp.float32) + b
        if li < n_layers - 1:                             # heads: no activation
            h = _leaky(h)
    o_ref[...] = h


# ----------------------------------------------------------------------------
# Parameters (deterministic, PyTorch-ish uniform fan-in init).
# Linear weights stored as (in, out); PyTorch's (out, in) + x @ W.T is identical.
# ----------------------------------------------------------------------------
def init_params(key, input_channels=26, action_space_size=6):
    keys = jax.random.split(key, 16)

    def u(k, shape, fan_in):
        bound = 1.0 / float(fan_in) ** 0.5
        return jax.random.uniform(k, shape, jnp.float32, -bound, bound)

    p = {}
    p["c1w"] = u(keys[0], (25, input_channels, 5, 5), input_channels * 25)
    p["c1b"] = u(keys[1], (25,), input_channels * 25)
    p["c2w"] = u(keys[2], (25, 25, 3, 3), 25 * 9)
    p["c2b"] = u(keys[3], (25,), 25 * 9)
    p["c3w"] = u(keys[4], (25, 25, 3, 3), 25 * 9)
    p["c3b"] = u(keys[5], (25,), 25 * 9)
    p["f1w"] = u(keys[6], (150, 32), 150)
    p["f1b"] = u(keys[7], (32,), 150)
    p["f2w"] = u(keys[8], (32, 32), 32)
    p["f2b"] = u(keys[9], (32,), 32)
    p["f3w"] = u(keys[10], (32, 32), 32)
    p["f3b"] = u(keys[11], (32,), 32)
    p["aw"] = u(keys[12], (32, action_space_size), 32)
    p["ab"] = u(keys[13], (action_space_size,), 32)
    p["vw"] = u(keys[14], (32, 1), 32)
    p["vb"] = u(keys[15], (1,), 32)
    return p


# ----------------------------------------------------------------------------
# One-time (init) fold of the convs into dense Toeplitz matrices + padding of
# weights/biases to aligned shapes.  Pure JAX; not on the forward hot path.
# ----------------------------------------------------------------------------
def _conv_to_dense(w, H, W, pad):
    """T s.t. conv(x).reshape(Cout*Ho*Wo) == x.reshape(Cin*H*W) @ T (no bias)."""
    Cout, Cin, kh, kw = w.shape
    eye = jnp.eye(Cin * H * W, dtype=jnp.float32).reshape(Cin * H * W, Cin, H, W)
    y = lax.conv_general_dilated(
        eye, w.astype(jnp.float32), (1, 1), [(pad, pad), (pad, pad)],
        dimension_numbers=("NCHW", "OIHW", "NCHW"))
    Ho, Wo = y.shape[2], y.shape[3]
    return y.reshape(Cin * H * W, Cout * Ho * Wo), (Ho, Wo)


def prepare_fused_params(p, H=4, W=5, param_dtype=jnp.bfloat16):
    t1, (h1, w1) = _conv_to_dense(p["c1w"], H, W, pad=2)    # 'same', k=5 -> (520, 500)
    t2, (h2, w2) = _conv_to_dense(p["c2w"], h1, w1, pad=0)  # 'valid', k=3 -> (500, 150)
    t3, (h3, w3) = _conv_to_dense(p["c3w"], h2, w2, pad=1)  # 'same', k=3 -> (150, 150)
    bb1 = jnp.repeat(p["c1b"], h1 * w1)   # bias broadcast over (Ho, Wo), C-major
    bb2 = jnp.repeat(p["c2b"], h2 * w2)
    bb3 = jnp.repeat(p["c3b"], h3 * w3)
    # Fuse action + value heads into one matmul (identical math).
    hw = jnp.concatenate([p["aw"], p["vw"]], axis=1)        # (32, A+1)
    hb = jnp.concatenate([p["ab"], p["vb"]], axis=0)        # (A+1,)

    layers = [
        (t1, bb1), (t2, bb2), (t3, bb3),
        (p["f1w"], p["f1b"]), (p["f2w"], p["f2b"]), (p["f3w"], p["f3b"]),
        (hw, hb),
    ]
    fused = []
    for li, (wmat, bvec) in enumerate(layers):
        K, N = wmat.shape
        # Layer 0 keeps the true input width (only 8-aligned, 520 already is):
        # the x block spans the full last dim so no 128-lane padding is needed.
        Kp = _round_up(K, 8) if li == 0 else _round_up(K, 128)
        Np = _round_up(N, 128)                # never below 128, never inflated to 256
        fused.append((_pad2(wmat, Kp, Np, param_dtype),
                      _pad2(bvec.reshape(1, N), 1, Np, jnp.float32)))
    return fused


# ----------------------------------------------------------------------------
# Batch-tile selection: minimize padding waste, then maximize the tile to
# amortize per-grid-step overhead, and prefer >=2 grid steps (v7x megacore)
# when that costs no extra padding.
# ----------------------------------------------------------------------------
_TILE_CANDIDATES = (8, 16, 32, 64, 128, 256, 512, 1024)


def _choose_tile_m(batch, tile_m_max=1024):
    b8 = _round_up(max(batch, 1), 8)
    cands = [t for t in _TILE_CANDIDATES if t <= tile_m_max] or [8]
    best_pad = min(_round_up(b8, t) for t in cands)
    allowed = best_pad + best_pad // 8            # accept <=12.5% extra padding
    tm = max(t for t in cands if _round_up(b8, t) <= allowed)
    bp = _round_up(b8, tm)
    if bp // tm == 1 and tm > 8:                  # free split -> 2 steps, 2 TCs on v7x
        tm //= 2
    return tm, bp


# ----------------------------------------------------------------------------
# Full forward pass == PPONetwork.forward  -> (action_logits, value)
# One pallas_call; batch axis gridded + "parallel" for megacore / large batch.
# NOTE: batches are padded up to the chosen tile (<=12.5% waste by design);
# the padded rows are sliced off before returning.
# ----------------------------------------------------------------------------
def ppo_forward(fused_params, obs, *, action_space_size=6, tile_m_max=1024):
    B = obs.shape[0]
    Kin = obs.shape[1] * obs.shape[2] * obs.shape[3]
    K1 = fused_params[0][0].shape[0]              # layer-1 input width (520, 8-aligned)
    Nout = fused_params[-1][0].shape[1]           # padded head width (128)
    if not (Kin <= K1 < Kin + 8):
        raise ValueError(f"obs feature size {Kin} does not match folded params ({K1})")

    x = obs.reshape(B, Kin).astype(jnp.float32)   # nn.Flatten order (C, H, W)

    tm, Bp = _choose_tile_m(B, tile_m_max)
    if Bp != B or K1 != Kin:                      # skip the HBM pad copy when possible
        x = jnp.pad(x, ((0, Bp - B), (0, K1 - Kin)))

    flat_params = []
    in_specs = [pl.BlockSpec((tm, K1), lambda i: (i, 0))]   # batch-tiled input stream
    for wmat, bvec in fused_params:               # grid-invariant, VMEM-resident
        flat_params += [wmat, bvec]
        in_specs += [pl.BlockSpec(wmat.shape, lambda i: (0, 0)),
                     pl.BlockSpec(bvec.shape, lambda i: (0, 0))]

    # Scale the scoped-VMEM limit with the tile; stay inside v7x's 64 MiB.
    vmem_limit = min(56 * 1024 * 1024, 16 * 1024 * 1024 + tm * 32 * 1024)

    out = pl.pallas_call(
        _fused_forward_kernel,
        out_shape=jax.ShapeDtypeStruct((Bp, Nout), jnp.float32),
        grid=(Bp // tm,),
        in_specs=in_specs,
        out_specs=pl.BlockSpec((tm, Nout), lambda i: (i, 0)),
        compiler_params=pltpu.CompilerParams(
            dimension_semantics=("parallel",),
            vmem_limit_bytes=vmem_limit),
    )(x, *flat_params)

    A = action_space_size
    return out[:B, :A], out[:B, A:A + 1]


# Pure-JAX reference (XLA conv on the unfused params) for correctness checks.
def ppo_forward_ref(params, obs):
    def conv(x, w, b, pad):
        y = lax.conv_general_dilated(
            x, w, (1, 1), [(pad, pad), (pad, pad)],
            dimension_numbers=("NCHW", "OIHW", "NCHW"))
        return _leaky(y + b[None, :, None, None])

    x = conv(obs, params["c1w"], params["c1b"], 2)
    x = conv(x, params["c2w"], params["c2b"], 0)
    x = conv(x, params["c3w"], params["c3b"], 1)
    x = x.reshape(x.shape[0], -1)
    x = _leaky(x @ params["f1w"] + params["f1b"])
    x = _leaky(x @ params["f2w"] + params["f2b"])
    x = _leaky(x @ params["f3w"] + params["f3b"])
    return x @ params["aw"] + params["ab"], x @ params["vw"] + params["vb"]


if __name__ == "__main__":
    key = jax.random.PRNGKey(0)
    k_params, k_obs = jax.random.split(key)

    params = init_params(k_params, input_channels=26, action_space_size=6)
    # Small deterministic input consistent with the module: (B, C, H, W) = (2, 26, 4, 5)
    obs = jax.random.normal(k_obs, (2, 26, 4, 5), dtype=jnp.float32)

    ref_logits, ref_value = ppo_forward_ref(params, obs)

    # 1) Exact-math check: f32 weights must match the XLA-conv reference tightly.
    fused_f32 = prepare_fused_params(params, param_dtype=jnp.float32)
    logits32, value32 = jax.jit(ppo_forward)(fused_f32, obs)
    jax.block_until_ready((logits32, value32))
    assert logits32.shape == (2, 6) and value32.shape == (2, 1)
    assert jnp.allclose(logits32, ref_logits, atol=1e-4, rtol=1e-4)
    assert jnp.allclose(value32, ref_value, atol=1e-4, rtol=1e-4)

    # 2) Production path: bf16 weights (2x MXU throughput), f32 accumulation.
    fused_bf16 = prepare_fused_params(params)            # default bf16
    logits, value = jax.jit(ppo_forward)(fused_bf16, obs)
    jax.block_until_ready((logits, value))
    assert logits.shape == (2, 6) and value.shape == (2, 1)
    assert jnp.allclose(logits, ref_logits, atol=2e-2, rtol=2e-2)
    assert jnp.allclose(value, ref_value, atol=2e-2, rtol=2e-2)

    print("KERNEL_OK")
</pallas_src>

<mosaic_0001>
module attributes {stable_mosaic.version = 11 : i64} {
  func.func @_fused_forward_kernel(%arg0: i32, %arg1: memref<8x520xf32, #tpu.memory_space<vmem>>, %arg2: memref<520x512xf32, #tpu.memory_space<vmem>>, %arg3: memref<1x512xf32, #tpu.memory_space<vmem>>, %arg4: memref<512x256xf32, #tpu.memory_space<vmem>>, %arg5: memref<1x256xf32, #tpu.memory_space<vmem>>, %arg6: memref<256x256xf32, #tpu.memory_space<vmem>>, %arg7: memref<1x256xf32, #tpu.memory_space<vmem>>, %arg8: memref<256x128xf32, #tpu.memory_space<vmem>>, %arg9: memref<1x128xf32, #tpu.memory_space<vmem>>, %arg10: memref<128x128xf32, #tpu.memory_space<vmem>>, %arg11: memref<1x128xf32, #tpu.memory_space<vmem>>, %arg12: memref<128x128xf32, #tpu.memory_space<vmem>>, %arg13: memref<1x128xf32, #tpu.memory_space<vmem>>, %arg14: memref<128x128xf32, #tpu.memory_space<vmem>>, %arg15: memref<1x128xf32, #tpu.memory_space<vmem>>, %arg16: memref<8x128xf32, #tpu.memory_space<vmem>>) attributes {dimension_semantics = [#tpu.dimension_semantics<parallel>], iteration_bounds = array<i64: 1>, scalar_prefetch = 0 : i64, scratch_operands = 0 : i64, tpu.core_type = #tpu.core_type<tc>, window_params = [{transform_indices = @transform_0, window_bounds = array<i64: 8, 520>}, {pipeline_mode = #tpu.pipeline_mode<synchronous>, transform_indices = @transform_1, window_bounds = array<i64: 520, 512>}, {pipeline_mode = #tpu.pipeline_mode<synchronous>, transform_indices = @transform_2, window_bounds = array<i64: 1, 512>}, {pipeline_mode = #tpu.pipeline_mode<synchronous>, transform_indices = @transform_3, window_bounds = array<i64: 512, 256>}, {pipeline_mode = #tpu.pipeline_mode<synchronous>, transform_indices = @transform_4, window_bounds = array<i64: 1, 256>}, {pipeline_mode = #tpu.pipeline_mode<synchronous>, transform_indices = @transform_5, window_bounds = array<i64: 256, 256>}, {pipeline_mode = #tpu.pipeline_mode<synchronous>, transform_indices = @transform_6, window_bounds = array<i64: 1, 256>}, {pipeline_mode = #tpu.pipeline_mode<synchronous>, transform_indices = @transform_7, window_bounds = array<i64: 256, 128>}, {pipeline_mode = #tpu.pipeline_mode<synchronous>, transform_indices = @transform_8, window_bounds = array<i64: 1, 128>}, {pipeline_mode = #tpu.pipeline_mode<synchronous>, transform_indices = @transform_9, window_bounds = array<i64: 128, 128>}, {pipeline_mode = #tpu.pipeline_mode<synchronous>, transform_indices = @transform_10, window_bounds = array<i64: 1, 128>}, {pipeline_mode = #tpu.pipeline_mode<synchronous>, transform_indices = @transform_11, window_bounds = array<i64: 128, 128>}, {pipeline_mode = #tpu.pipeline_mode<synchronous>, transform_indices = @transform_12, window_bounds = array<i64: 1, 128>}, {pipeline_mode = #tpu.pipeline_mode<synchronous>, transform_indices = @transform_13, window_bounds = array<i64: 128, 128>}, {pipeline_mode = #tpu.pipeline_mode<synchronous>, transform_indices = @transform_14, window_bounds = array<i64: 1, 128>}, {transform_indices = @transform_15, window_bounds = array<i64: 8, 128>}]} {
    %c0 = arith.constant 0 : index
    %c0_0 = arith.constant 0 : index
    %0 = vector.load %arg1[%c0, %c0_0] : memref<8x520xf32, #tpu.memory_space<vmem>>, vector<8x520xf32>
    %c0_1 = arith.constant 0 : index
    %c0_2 = arith.constant 0 : index
    %1 = vector.load %arg2[%c0_1, %c0_2] : memref<520x512xf32, #tpu.memory_space<vmem>>, vector<520x512xf32>
    %c0_3 = arith.constant 0 : index
    %c0_4 = arith.constant 0 : index
    %2 = vector.load %arg3[%c0_3, %c0_4] : memref<1x512xf32, #tpu.memory_space<vmem>>, vector<1x512xf32>
    %cst = arith.constant dense<0.000000e+00> : vector<8x512xf32>
    %3 = tpu.matmul %0, %1, %cst {dimension_numbers = #tpu.dot_dimension_numbers<[1], [0], [0], [1], [0, 0, 1, 1], [], []>} : vector<8x520xf32>, vector<520x512xf32>, vector<8x512xf32> -> vector<8x512xf32>
    %4 = vector.broadcast %2 : vector<1x512xf32> to vector<8x512xf32>
    %5 = arith.addf %3, %4 : vector<8x512xf32>
    %cst_5 = arith.constant 0.000000e+00 : f32
    %6 = vector.broadcast %cst_5 : f32 to vector<8x512xf32>
    %7 = arith.cmpf ogt, %5, %6 : vector<8x512xf32>
    %cst_6 = arith.constant 0.00999999977 : f32
    %8 = vector.broadcast %cst_6 : f32 to vector<8x512xf32>
    %9 = arith.mulf %8, %5 : vector<8x512xf32>
    %10 = arith.select %7, %5, %9 : vector<8x512xi1>, vector<8x512xf32>
    %c0_7 = arith.constant 0 : index
    %c0_8 = arith.constant 0 : index
    %11 = vector.load %arg4[%c0_7, %c0_8] : memref<512x256xf32, #tpu.memory_space<vmem>>, vector<512x256xf32>
    %c0_9 = arith.constant 0 : index
    %c0_10 = arith.constant 0 : index
    %12 = vector.load %arg5[%c0_9, %c0_10] : memref<1x256xf32, #tpu.memory_space<vmem>>, vector<1x256xf32>
    %cst_11 = arith.constant dense<0.000000e+00> : vector<8x256xf32>
    %13 = tpu.matmul %10, %11, %cst_11 {dimension_numbers = #tpu.dot_dimension_numbers<[1], [0], [0], [1], [0, 0, 1, 1], [], []>} : vector<8x512xf32>, vector<512x256xf32>, vector<8x256xf32> -> vector<8x256xf32>
    %14 = vector.broadcast %12 : vector<1x256xf32> to vector<8x256xf32>
    %15 = arith.addf %13, %14 : vector<8x256xf32>
    %cst_12 = arith.constant 0.000000e+00 : f32
    %16 = vector.broadcast %cst_12 : f32 to vector<8x256xf32>
    %17 = arith.cmpf ogt, %15, %16 : vector<8x256xf32>
    %cst_13 = arith.constant 0.00999999977 : f32
    %18 = vector.broadcast %cst_13 : f32 to vector<8x256xf32>
    %19 = arith.mulf %18, %15 : vector<8x256xf32>
    %20 = arith.select %17, %15, %19 : vector<8x256xi1>, vector<8x256xf32>
    %c0_14 = arith.constant 0 : index
    %c0_15 = arith.constant 0 : index
    %21 = vector.load %arg6[%c0_14, %c0_15] : memref<256x256xf32, #tpu.memory_space<vmem>>, vector<256x256xf32>
    %c0_16 = arith.constant 0 : index
    %c0_17 = arith.constant 0 : index
    %22 = vector.load %arg7[%c0_16, %c0_17] : memref<1x256xf32, #tpu.memory_space<vmem>>, vector<1x256xf32>
    %cst_18 = arith.constant dense<0.000000e+00> : vector<8x256xf32>
    %23 = tpu.matmul %20, %21, %cst_18 {dimension_numbers = #tpu.dot_dimension_numbers<[1], [0], [0], [1], [0, 0, 1, 1], [], []>} : vector<8x256xf32>, vector<256x256xf32>, vector<8x256xf32> -> vector<8x256xf32>
    %24 = vector.broadcast %22 : vector<1x256xf32> to vector<8x256xf32>
    %25 = arith.addf %23, %24 : vector<8x256xf32>
    %cst_19 = arith.constant 0.000000e+00 : f32
    %26 = vector.broadcast %cst_19 : f32 to vector<8x256xf32>
    %27 = arith.cmpf ogt, %25, %26 : vector<8x256xf32>
    %cst_20 = arith.constant 0.00999999977 : f32
    %28 = vector.broadcast %cst_20 : f32 to vector<8x256xf32>
    %29 = arith.mulf %28, %25 : vector<8x256xf32>
    %30 = arith.select %27, %25, %29 : vector<8x256xi1>, vector<8x256xf32>
    %c0_21 = arith.constant 0 : index
    %c0_22 = arith.constant 0 : index
    %31 = vector.load %arg8[%c0_21, %c0_22] : memref<256x128xf32, #tpu.memory_space<vmem>>, vector<256x128xf32>
    %c0_23 = arith.constant 0 : index
    %c0_24 = arith.constant 0 : index
    %32 = vector.load %arg9[%c0_23, %c0_24] : memref<1x128xf32, #tpu.memory_space<vmem>>, vector<1x128xf32>
    %cst_25 = arith.constant dense<0.000000e+00> : vector<8x128xf32>
    %33 = tpu.matmul %30, %31, %cst_25 {dimension_numbers = #tpu.dot_dimension_numbers<[1], [0], [0], [1], [0, 0, 1, 1], [], []>} : vector<8x256xf32>, vector<256x128xf32>, vector<8x128xf32> -> vector<8x128xf32>
    %34 = vector.broadcast %32 : vector<1x128xf32> to vector<8x128xf32>
    %35 = arith.addf %33, %34 : vector<8x128xf32>
    %cst_26 = arith.constant 0.000000e+00 : f32
    %36 = vector.broadcast %cst_26 : f32 to vector<8x128xf32>
    %37 = arith.cmpf ogt, %35, %36 : vector<8x128xf32>
    %cst_27 = arith.constant 0.00999999977 : f32
    %38 = vector.broadcast %cst_27 : f32 to vector<8x128xf32>
    %39 = arith.mulf %38, %35 : vector<8x128xf32>
    %40 = arith.select %37, %35, %39 : vector<8x128xi1>, vector<8x128xf32>
    %c0_28 = arith.constant 0 : index
    %c0_29 = arith.constant 0 : index
    %41 = vector.load %arg10[%c0_28, %c0_29] : memref<128x128xf32, #tpu.memory_space<vmem>>, vector<128x128xf32>
    %c0_30 = arith.constant 0 : index
    %c0_31 = arith.constant 0 : index
    %42 = vector.load %arg11[%c0_30, %c0_31] : memref<1x128xf32, #tpu.memory_space<vmem>>, vector<1x128xf32>
    %cst_32 = arith.constant dense<0.000000e+00> : vector<8x128xf32>
    %43 = tpu.matmul %40, %41, %cst_32 {dimension_numbers = #tpu.dot_dimension_numbers<[1], [0], [0], [1], [0, 0, 1, 1], [], []>} : vector<8x128xf32>, vector<128x128xf32>, vector<8x128xf32> -> vector<8x128xf32>
    %44 = vector.broadcast %42 : vector<1x128xf32> to vector<8x128xf32>
    %45 = arith.addf %43, %44 : vector<8x128xf32>
    %cst_33 = arith.constant 0.000000e+00 : f32
    %46 = vector.broadcast %cst_33 : f32 to vector<8x128xf32>
    %47 = arith.cmpf ogt, %45, %46 : vector<8x128xf32>
    %cst_34 = arith.constant 0.00999999977 : f32
    %48 = vector.broadcast %cst_34 : f32 to vector<8x128xf32>
    %49 = arith.mulf %48, %45 : vector<8x128xf32>
    %50 = arith.select %47, %45, %49 : vector<8x128xi1>, vector<8x128xf32>
    %c0_35 = arith.constant 0 : index
    %c0_36 = arith.constant 0 : index
    %51 = vector.load %arg12[%c0_35, %c0_36] : memref<128x128xf32, #tpu.memory_space<vmem>>, vector<128x128xf32>
    %c0_37 = arith.constant 0 : index
    %c0_38 = arith.constant 0 : index
    %52 = vector.load %arg13[%c0_37, %c0_38] : memref<1x128xf32, #tpu.memory_space<vmem>>, vector<1x128xf32>
    %cst_39 = arith.constant dense<0.000000e+00> : vector<8x128xf32>
    %53 = tpu.matmul %50, %51, %cst_39 {dimension_numbers = #tpu.dot_dimension_numbers<[1], [0], [0], [1], [0, 0, 1, 1], [], []>} : vector<8x128xf32>, vector<128x128xf32>, vector<8x128xf32> -> vector<8x128xf32>
    %54 = vector.broadcast %52 : vector<1x128xf32> to vector<8x128xf32>
    %55 = arith.addf %53, %54 : vector<8x128xf32>
    %cst_40 = arith.constant 0.000000e+00 : f32
    %56 = vector.broadcast %cst_40 : f32 to vector<8x128xf32>
    %57 = arith.cmpf ogt, %55, %56 : vector<8x128xf32>
    %cst_41 = arith.constant 0.00999999977 : f32
    %58 = vector.broadcast %cst_41 : f32 to vector<8x128xf32>
    %59 = arith.mulf %58, %55 : vector<8x128xf32>
    %60 = arith.select %57, %55, %59 : vector<8x128xi1>, vector<8x128xf32>
    %c0_42 = arith.constant 0 : index
    %c0_43 = arith.constant 0 : index
    %61 = vector.load %arg14[%c0_42, %c0_43] : memref<128x128xf32, #tpu.memory_space<vmem>>, vector<128x128xf32>
    %c0_44 = arith.constant 0 : index
    %c0_45 = arith.constant 0 : index
    %62 = vector.load %arg15[%c0_44, %c0_45] : memref<1x128xf32, #tpu.memory_space<vmem>>, vector<1x128xf32>
    %cst_46 = arith.constant dense<0.000000e+00> : vector<8x128xf32>
    %63 = tpu.matmul %60, %61, %cst_46 {dimension_numbers = #tpu.dot_dimension_numbers<[1], [0], [0], [1], [0, 0, 1, 1], [], []>} : vector<8x128xf32>, vector<128x128xf32>, vector<8x128xf32> -> vector<8x128xf32>
    %64 = vector.broadcast %62 : vector<1x128xf32> to vector<8x128xf32>
    %65 = arith.addf %63, %64 : vector<8x128xf32>
    %c0_47 = arith.constant 0 : index
    %c0_48 = arith.constant 0 : index
    %66 = vector.load %arg16[%c0_47, %c0_48] : memref<8x128xf32, #tpu.memory_space<vmem>>, vector<8x128xf32>
    tpu.vector_store %arg16[%c0_47, %c0_48], %65 {strides = array<i32>} : memref<8x128xf32, #tpu.memory_space<vmem>>, vector<8x128xf32>,
    return
  }
  func.func @transform_0(%arg0: i32) -> (i32, i32) {
    %c0_i32 = arith.constant 0 : i32
    %c0_i32_0 = arith.constant 0 : i32
    return %arg0, %c0_i32 : i32, i32
  }
  func.func @transform_1(%arg0: i32) -> (i32, i32) {
    %c0_i32 = arith.constant 0 : i32
    %c0_i32_0 = arith.constant 0 : i32
    %c0_i32_1 = arith.constant 0 : i32
    return %c0_i32, %c0_i32_0 : i32, i32
  }
  func.func @transform_2(%arg0: i32) -> (i32, i32) {
    %c0_i32 = arith.constant 0 : i32
    %c0_i32_0 = arith.constant 0 : i32
    %c0_i32_1 = arith.constant 0 : i32
    return %c0_i32, %c0_i32_0 : i32, i32
  }
  func.func @transform_3(%arg0: i32) -> (i32, i32) {
    %c0_i32 = arith.constant 0 : i32
    %c0_i32_0 = arith.constant 0 : i32
    %c0_i32_1 = arith.constant 0 : i32
    return %c0_i32, %c0_i32_0 : i32, i32
  }
  func.func @transform_4(%arg0: i32) -> (i32, i32) {
    %c0_i32 = arith.constant 0 : i32
    %c0_i32_0 = arith.constant 0 : i32
    %c0_i32_1 = arith.constant 0 : i32
    return %c0_i32, %c0_i32_0 : i32, i32
  }
  func.func @transform_5(%arg0: i32) -> (i32, i32) {
    %c0_i32 = arith.constant 0 : i32
    %c0_i32_0 = arith.constant 0 : i32
    %c0_i32_1 = arith.constant 0 : i32
    return %c0_i32, %c0_i32_0 : i32, i32
  }
  func.func @transform_6(%arg0: i32) -> (i32, i32) {
    %c0_i32 = arith.constant 0 : i32
    %c0_i32_0 = arith.constant 0 : i32
    %c0_i32_1 = arith.constant 0 : i32
    return %c0_i32, %c0_i32_0 : i32, i32
  }
  func.func @transform_7(%arg0: i32) -> (i32, i32) {
    %c0_i32 = arith.constant 0 : i32
    %c0_i32_0 = arith.constant 0 : i32
    %c0_i32_1 = arith.constant 0 : i32
    return %c0_i32, %c0_i32_0 : i32, i32
  }
  func.func @transform_8(%arg0: i32) -> (i32, i32) {
    %c0_i32 = arith.constant 0 : i32
    %c0_i32_0 = arith.constant 0 : i32
    %c0_i32_1 = arith.constant 0 : i32
    return %c0_i32, %c0_i32_0 : i32, i32
  }
  func.func @transform_9(%arg0: i32) -> (i32, i32) {
    %c0_i32 = arith.constant 0 : i32
    %c0_i32_0 = arith.constant 0 : i32
    %c0_i32_1 = arith.constant 0 : i32
    return %c0_i32, %c0_i32_0 : i32, i32
  }
  func.func @transform_10(%arg0: i32) -> (i32, i32) {
    %c0_i32 = arith.constant 0 : i32
    %c0_i32_0 = arith.constant 0 : i32
    %c0_i32_1 = arith.constant 0 : i32
    return %c0_i32, %c0_i32_0 : i32, i32
  }
  func.func @transform_11(%arg0: i32) -> (i32, i32) {
    %c0_i32 = arith.constant 0 : i32
    %c0_i32_0 = arith.constant 0 : i32
    %c0_i32_1 = arith.constant 0 : i32
    return %c0_i32, %c0_i32_0 : i32, i32
  }
  func.func @transform_12(%arg0: i32) -> (i32, i32) {
    %c0_i32 = arith.constant 0 : i32
    %c0_i32_0 = arith.constant 0 : i32
    %c0_i32_1 = arith.constant 0 : i32
    return %c0_i32, %c0_i32_0 : i32, i32
  }
  func.func @transform_13(%arg0: i32) -> (i32, i32) {
    %c0_i32 = arith.constant 0 : i32
    %c0_i32_0 = arith.constant 0 : i32
    %c0_i32_1 = arith.constant 0 : i32
    return %c0_i32, %c0_i32_0 : i32, i32
  }
  func.func @transform_14(%arg0: i32) -> (i32, i32) {
    %c0_i32 = arith.constant 0 : i32
    %c0_i32_0 = arith.constant 0 : i32
    %c0_i32_1 = arith.constant 0 : i32
    return %c0_i32, %c0_i32_0 : i32, i32
  }
  func.func @transform_15(%arg0: i32) -> (i32, i32) {
    %c0_i32 = arith.constant 0 : i32
    %c0_i32_0 = arith.constant 0 : i32
    return %arg0, %c0_i32 : i32, i32
  }
}

</mosaic_0001>

<bundles_post_ra>
// kernel: ppo_forward.1
= control target key start
LH: loop header
LB: loop body
LE: loop exit
PB: predicated region body
PF: predicated region fallthrough
CT: control target
= control target key end

     0   :  { %20 = vsyncpa [#allocation3], 0  ;;  %s3290_s0 = inlined_call_operand.vmem [shape: f32[8,520], index: 0, kind: input, shape index: {}]   ;;  %s3291_s1 = inlined_call_operand.hbm [shape: f32[520,512], index: 1, kind: input, shape index: {}]   ;;  %s3292_s2 = inlined_call_operand.hbm [shape: f32[1,512], index: 2, kind: input, shape index: {}]   ;;  %s3293_s3 = inlined_call_operand.hbm [shape: f32[512,256], index: 3, kind: input, shape index: {}]   ;;  %s3294_s4 = inlined_call_operand.hbm [shape: f32[1,256], index: 4, kind: input, shape index: {}]   ;;  %s3295_s5 = inlined_call_operand.hbm [shape: f32[256,256], index: 5, kind: input, shape index: {}]   ;;  %s3296_s6 = inlined_call_operand.hbm [shape: f32[1,256], index: 6, kind: input, shape index: {}]   ;;  %s3297_s7 = inlined_call_operand.hbm [shape: f32[256,128], index: 7, kind: input, shape index: {}]   ;;  %s3298_s8 = inlined_call_operand.hbm [shape: f32[1,128], index: 8, kind: input, shape index: {}]   ;;  %s3299_s9 = inlined_call_operand.hbm [shape: f32[128,128], index: 9, kind: input, shape index: {}]   ;;  %s3300_s10 = inlined_call_operand.hbm [shape: f32[1,128], index: 10, kind: input, shape index: {}]   ;;  %s3301_s11 = inlined_call_operand.hbm [shape: f32[128,128], index: 11, kind: input, shape index: {}]   ;;  %s3302_s12 = inlined_call_operand.hbm [shape: f32[1,128], index: 12, kind: input, shape index: {}]   ;;  %s3303_s13 = inlined_call_operand.hbm [shape: f32[128,128], index: 13, kind: input, shape index: {}]   ;;  %s3304_s14 = inlined_call_operand.hbm [shape: f32[1,128], index: 14, kind: input, shape index: {}]   ;;  %s3305_s15 = inlined_call_operand.vmem [shape: f32[8,128], index: 15, kind: output, shape index: {}]  }
   0x1   :  { %21 = vsyncpa [#allocation5], 0 }
   0x2   :  { %22 = vsyncpa [#allocation8], 0 }
   0x3   :  { %23 = vsyncpa [#allocation11], 0 }
   0x4   :  { %24 = vsyncpa [#allocation14], 0 }
   0x5   :  { %25 = vsyncpa [#allocation17], 0 }
   0x6   :  { %26 = vsyncpa [#allocation20], 0 }
   0x7   :  { %27 = vsyncpa [#allocation23], 0  ;;  %s2918_s18 = smov [#allocation4]   ;;  %s2919_s20 = smov [#allocation7]  }
   0x8   :  { %s48_s19 = sshll.u32 %s2918_s18, 4  ;;  %s70_s21 = sshll.u32 %s2919_s20, 4  ;;  %s49_s19 = int_to_ptr.vmem [resolvable:$true] %s48_s19  ;;  %s71_s21 = int_to_ptr.vmem [resolvable:$true] %s70_s21 }
   0x9   :  { %s2594_s24 = scalar_lea.hbm %s3292_s2, 64 }
   0xa   :  { %p2595_p0 = scmp.ne.s32.totalorder %s3292_s2, %s2594_s24  ;;  %p2598_p1 = scmp.lt.u32.totalorder %s2594_s24, %s3292_s2 }
   0xc   :  { %p2600_p2 = pnand %p2598_p1, %p2595_p0 }
   0xe   :  { %2603 = shalt.err (!%p2600_p2)
}
   0xf   :  { %s2604_s29 = scalar_lea.vmem %s49_s19, 64  ;;  %p2609_p4 = scmp.lt.s32.totalorder %s49_s19, %s49_s19 }
  0x10   :  { %p2605_p3 = scmp.ne.s32.totalorder %s49_s19, %s2604_s29  ;;  %p2610_p5 = scmp.lt.s32.totalorder %s2604_s29, %s2604_s29 }
  0x12   :  { %p2611_p6 = por %p2610_p5, %p2609_p4 }
  0x14   :  { %p2612_p7 = pnand %p2611_p6, %p2605_p3 }
  0x16   :  { %2615 = shalt.err (!%p2612_p7)
}
  0x17   :  { %51 = dma.hbm_to_vmem [thread:$0]  %s3292_s2, 64, %s49_s19, [#allocation5]  }
  0x18   :  { %s2616_s20 = scalar_lea.hbm %s3294_s4, 32 }
  0x19   :  { %p2617_p8 = scmp.ne.s32.totalorder %s3294_s4, %s2616_s20  ;;  %p2620_p9 = scmp.lt.u32.totalorder %s2616_s20, %s3294_s4 }
  0x1b   :  { %p2622_p10 = pnand %p2620_p9, %p2617_p8 }
  0x1d   :  { %2625 = shalt.err (!%p2622_p10)
}
  0x1e   :  { %s2626_s26 = scalar_lea.vmem %s71_s21, 32  ;;  %p2631_p12 = scmp.lt.s32.totalorder %s71_s21, %s71_s21 }
  0x1f   :  { %p2627_p11 = scmp.ne.s32.totalorder %s71_s21, %s2626_s26  ;;  %p2632_p13 = scmp.lt.s32.totalorder %s2626_s26, %s2626_s26 }
  0x21   :  { %p2633_p0 = por %p2632_p13, %p2631_p12 }
  0x23   :  { %p2634_p1 = pnand %p2633_p0, %p2627_p11 }
  0x25   :  { %2637 = shalt.err (!%p2634_p1)
}
  0x26   :  { %73 = dma.hbm_to_vmem [thread:$0]  %s3294_s4, 32, %s71_s21, [#allocation8]  }
  0x27   :  { %s2920_s27 = smov [#allocation10]   ;;  %s2921_s29 = smov [#allocation13]  }
  0x28   :  { %s92_s28 = sshll.u32 %s2920_s27, 4  ;;  %s114_s30 = sshll.u32 %s2921_s29, 4  ;;  %s93_s28 = int_to_ptr.vmem [resolvable:$true] %s92_s28  ;;  %s115_s30 = int_to_ptr.vmem [resolvable:$true] %s114_s30 }
  0x29   :  { %s2638_s18 = scalar_lea.hbm %s3296_s6, 32 }
  0x2a   :  { %p2639_p2 = scmp.ne.s32.totalorder %s3296_s6, %s2638_s18  ;;  %p2642_p3 = scmp.lt.u32.totalorder %s2638_s18, %s3296_s6 }
  0x2c   :  { %p2644_p4 = pnand %p2642_p3, %p2639_p2 }
  0x2e   :  { %2647 = shalt.err (!%p2644_p4)
}
  0x2f   :  { %s2648_s4 = scalar_lea.vmem %s93_s28, 32  ;;  %p2653_p6 = scmp.lt.s32.totalorder %s93_s28, %s93_s28 }
  0x30   :  { %p2649_p5 = scmp.ne.s32.totalorder %s93_s28, %s2648_s4  ;;  %p2654_p7 = scmp.lt.s32.totalorder %s2648_s4, %s2648_s4 }
  0x32   :  { %p2655_p8 = por %p2654_p7, %p2653_p6 }
  0x34   :  { %p2656_p9 = pnand %p2655_p8, %p2649_p5 }
  0x36   :  { %2659 = shalt.err (!%p2656_p9)
}
  0x37   :  { %95 = dma.hbm_to_vmem [thread:$0]  %s3296_s6, 32, %s93_s28, [#allocation11]  }
  0x38   :  { %s2660_s19 = scalar_lea.hbm %s3298_s8, 16 }
  0x39   :  { %p2661_p10 = scmp.ne.s32.totalorder %s3298_s8, %s2660_s19  ;;  %p2664_p11 = scmp.lt.u32.totalorder %s2660_s19, %s3298_s8 }
  0x3b   :  { %p2666_p12 = pnand %p2664_p11, %p2661_p10 }
  0x3d   :  { %2669 = shalt.err (!%p2666_p12)
}
  0x3e   :  { %s2670_s18 = scalar_lea.vmem %s115_s30, 16  ;;  %s2674_s20 = scalar_lea.vmem %s115_s30, 32 }
  0x3f   :  { %p2671_p13 = scmp.ne.s32.totalorder %s115_s30, %s2670_s18  ;;  %p2675_p0 = scmp.lt.s32.totalorder %s115_s30, %s115_s30 }
  0x40   :  { %p2676_p1 = scmp.lt.s32.totalorder %s2674_s20, %s2670_s18 }
  0x42   :  { %p2677_p2 = por %p2676_p1, %p2675_p0 }
  0x44   :  { %p2678_p3 = pnand %p2677_p2, %p2671_p13 }
  0x46   :  { %2681 = shalt.err (!%p2678_p3)
}
  0x47   :  { %117 = dma.hbm_to_vmem [thread:$0]  %s3298_s8, 16, %s115_s30, [#allocation14]  }
  0x48   :  { %s2922_s22 = smov [#allocation16]   ;;  %s2923_s24 = smov [#allocation19]  }
  0x49   :  { %s136_s23 = sshll.u32 %s2922_s22, 4  ;;  %s158_s4 = sshll.u32 %s2923_s24, 4  ;;  %s137_s23 = int_to_ptr.vmem [resolvable:$true] %s136_s23  ;;  %s159_s4 = int_to_ptr.vmem [resolvable:$true] %s158_s4 }
  0x4a   :  { %s2682_s26 = scalar_lea.hbm %s3300_s10, 16 }
  0x4b   :  { %p2683_p4 = scmp.ne.s32.totalorder %s3300_s10, %s2682_s26  ;;  %p2686_p5 = scmp.lt.u32.totalorder %s2682_s26, %s3300_s10 }
  0x4d   :  { %p2688_p6 = pnand %p2686_p5, %p2683_p4 }
  0x4f   :  { %2691 = shalt.err (!%p2688_p6)
}
  0x50   :  { %s2692_s8 = scalar_lea.vmem %s137_s23, 16  ;;  %s2696_s30 = scalar_lea.vmem %s137_s23, 32 }
  0x51   :  { %p2693_p7 = scmp.ne.s32.totalorder %s137_s23, %s2692_s8  ;;  %p2697_p8 = scmp.lt.s32.totalorder %s137_s23, %s137_s23 }
  0x52   :  { %p2698_p9 = scmp.lt.s32.totalorder %s2696_s30, %s2692_s8 }
  0x54   :  { %p2699_p10 = por %p2698_p9, %p2697_p8 }
  0x56   :  { %p2700_p11 = pnand %p2699_p10, %p2693_p7 }
  0x58   :  { %2703 = shalt.err (!%p2700_p11)
}
  0x59   :  { %139 = dma.hbm_to_vmem [thread:$0]  %s3300_s10, 16, %s137_s23, [#allocation17]  }
  0x5a   :  { %s2704_s6 = scalar_lea.hbm %s3302_s12, 16 }
  0x5b   :  { %p2705_p12 = scmp.ne.s32.totalorder %s3302_s12, %s2704_s6  ;;  %p2708_p13 = scmp.lt.u32.totalorder %s2704_s6, %s3302_s12 }
  0x5d   :  { %p2710_p0 = pnand %p2708_p13, %p2705_p12 }
  0x5f   :  { %2713 = shalt.err (!%p2710_p0)
}
  0x60   :  { %s2714_s25 = scalar_lea.vmem %s159_s4, 16  ;;  %s2718_s26 = scalar_lea.vmem %s159_s4, 32 }
  0x61   :  { %p2715_p1 = scmp.ne.s32.totalorder %s159_s4, %s2714_s25  ;;  %p2719_p2 = scmp.lt.s32.totalorder %s159_s4, %s159_s4 }
  0x62   :  { %p2720_p3 = scmp.lt.s32.totalorder %s2718_s26, %s2714_s25 }
  0x64   :  { %p2721_p4 = por %p2720_p3, %p2719_p2 }
  0x66   :  { %p2722_p5 = pnand %p2721_p4, %p2715_p1 }
  0x68   :  { %2725 = shalt.err (!%p2722_p5)
}
  0x69   :  { %161 = dma.hbm_to_vmem [thread:$0]  %s3302_s12, 16, %s159_s4, [#allocation20]  }
  0x6a   :  { %s2924_s2 = smov [#allocation2]   ;;  %s2726_s8 = scalar_lea.hbm %s3291_s1, 33280 }
  0x6b   :  { %s35_s19 = sshll.u32 %s2924_s2, 4  ;;  %p2727_p6 = scmp.ne.s32.totalorder %s3291_s1, %s2726_s8  ;;  %s36_s19 = int_to_ptr.vmem [resolvable:$true] %s35_s19 }
  0x6c   :  { %p2730_p7 = scmp.lt.u32.totalorder %s2726_s8, %s3291_s1 }
  0x6e   :  { %p2732_p8 = pnand %p2730_p7, %p2727_p6 }
  0x70   :  { %2735 = shalt.err (!%p2732_p8)
}
  0x71   :  { %s2736_s20 = scalar_lea.vmem %s36_s19, 33280  ;;  %p2741_p10 = scmp.lt.s32.totalorder %s36_s19, %s36_s19 }
  0x72   :  { %p2737_p9 = scmp.ne.s32.totalorder %s36_s19, %s2736_s20  ;;  %p2742_p11 = scmp.lt.s32.totalorder %s2736_s20, %s2736_s20 }
  0x74   :  { %p2743_p12 = por %p2742_p11, %p2741_p10 }
  0x76   :  { %p2744_p13 = pnand %p2743_p12, %p2737_p9 }
  0x78   :  { %2747 = shalt.err (!%p2744_p13)
}
  0x79   :  { %s2925_s12 = smov 512   ;;  %s2926_s4 = smov 32  }
  0x7a   :  { %41 = dma.hbm_to_vmem [thread:$0]  %s3291_s1, 33280, %s36_s19, [#allocation3], %s2925_s12, %s2925_s12, %s2926_s4  }
  0x7b   :  { %s2927_s22 = smov [#allocation6]   ;;  %s2748_s26 = scalar_lea.hbm %s3293_s3, 16384 }
  0x7c   :  { %s57_s24 = sshll.u32 %s2927_s22, 4  ;;  %p2749_p0 = scmp.ne.s32.totalorder %s3293_s3, %s2748_s26  ;;  %s58_s24 = int_to_ptr.vmem [resolvable:$true] %s57_s24 }
  0x7d   :  { %p2752_p1 = scmp.lt.u32.totalorder %s2748_s26, %s3293_s3 }
  0x7f   :  { %p2754_p2 = pnand %p2752_p1, %p2749_p0 }
  0x81   :  { %2757 = shalt.err (!%p2754_p2)
}
  0x82   :  { %s2758_s29 = scalar_lea.vmem %s58_s24, 16384  ;;  %p2763_p4 = scmp.lt.s32.totalorder %s58_s24, %s58_s24 }
  0x83   :  { %p2759_p3 = scmp.ne.s32.totalorder %s58_s24, %s2758_s29  ;;  %p2764_p5 = scmp.lt.s32.totalorder %s2758_s29, %s2758_s29 }
  0x85   :  { %p2765_p6 = por %p2764_p5, %p2763_p4 }
  0x87   :  { %p2766_p7 = pnand %p2765_p6, %p2759_p3 }
  0x89   :  { %2769 = shalt.err (!%p2766_p7)
}
  0x8a   :  { %s2928_s1 = smov 256   ;;  %s2929_s19 = smov 16  }
  0x8b   :  { %63 = dma.hbm_to_vmem [thread:$0]  %s3293_s3, 16384, %s58_s24, [#allocation5], %s2928_s1, %s2928_s1, %s2929_s19  }
  0x8c   :  { %s2930_s16 = smov [#allocation9]   ;;  %s2931_s18 = smov [#allocation12]  }
  0x8d   :  { %s79_s17 = sshll.u32 %s2930_s16, 4  ;;  %s101_s20 = sshll.u32 %s2931_s18, 4  ;;  %s80_s17 = int_to_ptr.vmem [resolvable:$true] %s79_s17  ;;  %s3117_s20 = int_to_ptr.vmem [resolvable:$true] %s101_s20 }
  0x8e   :  { %s2770_s6 = scalar_lea.hbm %s3295_s5, 8192 }
  0x8f   :  { %p2771_p8 = scmp.ne.s32.totalorder %s3295_s5, %s2770_s6  ;;  %p2774_p9 = scmp.lt.u32.totalorder %s2770_s6, %s3295_s5 }
  0x91   :  { %p2776_p10 = pnand %p2774_p9, %p2771_p8 }
  0x93   :  { %2779 = shalt.err (!%p2776_p10)
}
  0x94   :  { %s2780_s3 = scalar_lea.vmem %s80_s17, 8192  ;;  %p2785_p12 = scmp.lt.s32.totalorder %s80_s17, %s80_s17 }
  0x95   :  { %p2781_p11 = scmp.ne.s32.totalorder %s80_s17, %s2780_s3  ;;  %p2786_p13 = scmp.lt.s32.totalorder %s2780_s3, %s2780_s3 }
  0x97   :  { %p2787_p0 = por %p2786_p13, %p2785_p12 }
  0x99   :  { %p2788_p1 = pnand %p2787_p0, %p2781_p11 }
  0x9b   :  { %2791 = shalt.err (!%p2788_p1)
}
  0x9c   :  { %85 = dma.hbm_to_vmem [thread:$0]  %s3295_s5, 8192, %s80_s17, [#allocation8], %s2928_s1, %s2928_s1, %s2929_s19  }
  0x9d   :  { %s2792_s2 = scalar_lea.hbm %s3297_s7, 4096 }
  0x9e   :  { %p2793_p2 = scmp.ne.s32.totalorder %s3297_s7, %s2792_s2  ;;  %p2796_p3 = scmp.lt.u32.totalorder %s2792_s2, %s3297_s7 }
  0xa0   :  { %p2798_p4 = pnand %p2796_p3, %p2793_p2 }
  0xa2   :  { %2801 = shalt.err (!%p2798_p4)
}
  0xa3   :  { %s2802_s16 = scalar_lea.vmem %s3117_s20, 4096  ;;  %p2807_p6 = scmp.lt.s32.totalorder %s3117_s20, %s3117_s20 }
  0xa4   :  { %p2803_p5 = scmp.ne.s32.totalorder %s3117_s20, %s2802_s16  ;;  %p2808_p7 = scmp.lt.s32.totalorder %s2802_s16, %s2802_s16 }
  0xa6   :  { %p2809_p8 = por %p2808_p7, %p2807_p6 }
  0xa8   :  { %p2810_p9 = pnand %p2809_p8, %p2803_p5 }
  0xaa   :  { %2813 = shalt.err (!%p2810_p9)
}
  0xab   :  { %s2932_s5 = smov 128   ;;  %s2933_s1 = smov 8  }
  0xac   :  { %107 = dma.hbm_to_vmem [thread:$0]  %s3297_s7, 4096, %s3117_s20, [#allocation11], %s2932_s5, %s2932_s5, %s2933_s1  }
  0xad   :  { %s2934_s18 = smov [#allocation15]   ;;  %s2935_s4 = smov [#allocation18]  }
  0xae   :  { %s123_s12 = sshll.u32 %s2934_s18, 4  ;;  %s145_s6 = sshll.u32 %s2935_s4, 4  ;;  %s124_s12 = int_to_ptr.vmem [resolvable:$true] %s123_s12  ;;  %s3151_s6 = int_to_ptr.vmem [resolvable:$true] %s145_s6 }
  0xaf   :  { %s2814_s21 = scalar_lea.hbm %s3299_s9, 2048 }
  0xb0   :  { %p2815_p10 = scmp.ne.s32.totalorder %s3299_s9, %s2814_s21  ;;  %p2818_p11 = scmp.lt.u32.totalorder %s2814_s21, %s3299_s9 }
  0xb2   :  { %p2820_p12 = pnand %p2818_p11, %p2815_p10 }
  0xb4   :  { %2823 = shalt.err (!%p2820_p12)
}
  0xb5   :  { %s2824_s7 = scalar_lea.vmem %s124_s12, 2048  ;;  %p2829_p0 = scmp.lt.s32.totalorder %s124_s12, %s124_s12 }
  0xb6   :  { %p2825_p13 = scmp.ne.s32.totalorder %s124_s12, %s2824_s7  ;;  %p2830_p1 = scmp.lt.s32.totalorder %s2824_s7, %s2824_s7 }
  0xb8   :  { %p2831_p2 = por %p2830_p1, %p2829_p0 }
  0xba   :  { %p2832_p3 = pnand %p2831_p2, %p2825_p13 }
  0xbc   :  { %2835 = shalt.err (!%p2832_p3)
}
  0xbd   :  { %129 = dma.hbm_to_vmem [thread:$0]  %s3299_s9, 2048, %s124_s12, [#allocation14], %s2932_s5, %s2932_s5, %s2933_s1  }
  0xbe   :  { %s2836_s27 = scalar_lea.hbm %s3301_s11, 2048 }
  0xbf   :  { %p2837_p4 = scmp.ne.s32.totalorder %s3301_s11, %s2836_s27  ;;  %p2840_p5 = scmp.lt.u32.totalorder %s2836_s27, %s3301_s11 }
  0xc1   :  { %p2842_p6 = pnand %p2840_p5, %p2837_p4 }
  0xc3   :  { %2845 = shalt.err (!%p2842_p6)
}
  0xc4   :  { %s2846_s19 = scalar_lea.vmem %s3151_s6, 2048  ;;  %p2851_p8 = scmp.lt.s32.totalorder %s3151_s6, %s3151_s6 }
  0xc5   :  { %p2847_p7 = scmp.ne.s32.totalorder %s3151_s6, %s2846_s19  ;;  %p2852_p9 = scmp.lt.s32.totalorder %s2846_s19, %s2846_s19 }
  0xc7   :  { %p2853_p10 = por %p2852_p9, %p2851_p8 }
  0xc9   :  { %p2854_p11 = pnand %p2853_p10, %p2847_p7 }
  0xcb   :  { %2857 = shalt.err (!%p2854_p11)
}
  0xcc   :  { %151 = dma.hbm_to_vmem [thread:$0]  %s3301_s11, 2048, %s3151_s6, [#allocation17], %s2932_s5, %s2932_s5, %s2933_s1  }
  0xcd   :  { %s2936_s18 = smov [#allocation21]   ;;  %s2937_s4 = smov [#allocation22]  }
  0xce   :  { %s167_s12 = sshll.u32 %s2936_s18, 4  ;;  %s180_s28 = sshll.u32 %s2937_s4, 4  ;;  %s168_s12 = int_to_ptr.vmem [resolvable:$true] %s167_s12  ;;  %s181_s28 = int_to_ptr.vmem [resolvable:$true] %s180_s28 }
  0xcf   :  { %s2858_s25 = scalar_lea.hbm %s3303_s13, 2048 }
  0xd0   :  { %p2859_p12 = scmp.ne.s32.totalorder %s3303_s13, %s2858_s25  ;;  %p2862_p13 = scmp.lt.u32.totalorder %s2858_s25, %s3303_s13 }
  0xd2   :  { %p2864_p0 = pnand %p2862_p13, %p2859_p12 }
  0xd4   :  { %2867 = shalt.err (!%p2864_p0)
}
  0xd5   :  { %s2868_s11 = scalar_lea.vmem %s168_s12, 2048  ;;  %p2873_p2 = scmp.lt.s32.totalorder %s168_s12, %s168_s12 }
  0xd6   :  { %p2869_p1 = scmp.ne.s32.totalorder %s168_s12, %s2868_s11  ;;  %p2874_p3 = scmp.lt.s32.totalorder %s2868_s11, %s2868_s11 }
  0xd8   :  { %p2875_p4 = por %p2874_p3, %p2873_p2 }
  0xda   :  { %p2876_p5 = pnand %p2875_p4, %p2869_p1 }
  0xdc   :  { %2879 = shalt.err (!%p2876_p5)
}
  0xdd   :  { %173 = dma.hbm_to_vmem [thread:$0]  %s3303_s13, 2048, %s168_s12, [#allocation20], %s2932_s5, %s2932_s5, %s2933_s1  }
  0xde   :  { %s2880_s2 = scalar_lea.hbm %s3304_s14, 16 }
  0xdf   :  { %p2881_p6 = scmp.ne.s32.totalorder %s3304_s14, %s2880_s2  ;;  %p2884_p7 = scmp.lt.u32.totalorder %s2880_s2, %s3304_s14 }
  0xe1   :  { %p2886_p8 = pnand %p2884_p7, %p2881_p6 }
  0xe3   :  { %2889 = shalt.err (!%p2886_p8)
}
  0xe4   :  { %s2890_s16 = scalar_lea.vmem %s181_s28, 16  ;;  %s2894_s19 = scalar_lea.vmem %s181_s28, 32 }
  0xe5   :  { %p2891_p9 = scmp.ne.s32.totalorder %s181_s28, %s2890_s16  ;;  %p2895_p10 = scmp.lt.s32.totalorder %s181_s28, %s181_s28 }
  0xe6   :  { %p2896_p11 = scmp.lt.s32.totalorder %s2894_s19, %s2890_s16 }
  0xe8   :  { %p2897_p12 = por %p2896_p11, %p2895_p10 }
  0xea   :  { %p2898_p13 = pnand %p2897_p12, %p2891_p9 }
  0xec   :  { %2901 = shalt.err (!%p2898_p13)
}
  0xed   :  { %183 = dma.hbm_to_vmem [thread:$0]  %s3304_s14, 16, %s181_s28, [#allocation23]  }
  0xee   :  { %2902 = dma.done.wait [#allocation3], 33280  }
  0xef   :  { %2903 = vsyncadd [#allocation3], 4294934016 }
  0xf0   :  { %2904 = dma.done.wait [#allocation5], 16448  }
  0xf1   :  { %2905 = vsyncadd [#allocation5], 4294950848 }
  0xf2   :  { %2906 = dma.done.wait [#allocation8], 8224  }
  0xf3   :  { %2907 = vsyncadd [#allocation8], 4294959072 }
  0xf4   :  { %2908 = dma.done.wait [#allocation11], 4128  }
  0xf5   :  { %2909 = vsyncadd [#allocation11], 4294963168 }
  0xf6   :  { %2910 = dma.done.wait [#allocation14], 2064  }
  0xf7   :  { %2911 = vsyncadd [#allocation14], 4294965232 }
  0xf8   :  { %2912 = dma.done.wait [#allocation17], 2064  }
  0xf9   :  { %2913 = vsyncadd [#allocation17], 4294965232 }
  0xfa   :  { %2914 = dma.done.wait [#allocation20], 2064  }
  0xfb   :  { %2915 = vsyncadd [#allocation20], 4294965232 }
  0xfc   :  { %2916 = dma.done.wait [#allocation23], 16  }
  0xfd   :  { %2917 = vsyncadd [#allocation23], 4294967280  ;;  %v232_v0 = vld [vmem:[#allocation2 + $0x8] sm:$0xff]  ;;  %v234_v2 = vld [vmem:[#allocation2 + $0x18] sm:$0xff]  ;;  %vm513_vm0 = vcmask 64512   ;;  %vm2940_vm9 = vmmov 0  }
  0xfe   :  { %v236_v1 = vld [vmem:[#allocation2 + $0x28] sm:$0xff]  ;;  %v238_v4 = vld [vmem:[#allocation2 + $0x38] sm:$0xff]  ;;  %v231_v5 = vld [vmem:[#allocation2] sm:$0xff] }
  0xff   :  { %v2003_v3 = vpack.c.bf16 %v236_v1, %v232_v0  ;;  %v235_v6 = vld [vmem:[#allocation2 + $0x20] sm:$0xff]  ;;  %v2131_v7 = vpack.c.bf16 %v238_v4, %v234_v2  ;;  %v233_v9 = vld [vmem:[#allocation2 + $0x10] sm:$0xff]  ;;  %v240_v11 = vld [vmem:[#allocation2 + $0x48] sm:$0xff] }
 0x100   :  { %v2005_v8 = vpack.c.bf16 %v235_v6, %v231_v5  ;;  %v237_v10 = vld [vmem:[#allocation2 + $0x30] sm:$0xff]  ;;  %v244_v13 = vld [vmem:[#allocation2 + $0x68] sm:$0xff]  ;;  %v242_v14 = vld [vmem:[#allocation2 + $0x58] sm:$0xff] }
 0x101   :  { %2004 = vmatprep.subr.bf16.mxu0 %v2003_v3  ;;  %v2133_v12 = vpack.c.bf16 %v237_v10, %v233_v9  ;;  %v246_v15 = vld [vmem:[#allocation2 + $0x78] sm:$0xff]  ;;  %2132 = vmatprep.subr.bf16.mxu1 %v2131_v7  ;;  %v2007_v16 = vpack.c.bf16 %v244_v13, %v240_v11  ;;  %v239_v18 = vld [vmem:[#allocation2 + $0x40] sm:$0xff]  ;;  %v241_v20 = vld [vmem:[#allocation2 + $0x50] sm:$0xff] }
 0x102   :  { %2006 = vmatpush1.bf16.msra.mxu0 %v2005_v8  ;;  %v2135_v17 = vpack.c.bf16 %v246_v15, %v242_v14  ;;  %v243_v19 = vld [vmem:[#allocation2 + $0x60] sm:$0xff]  ;;  %v245_v22 = vld [vmem:[#allocation2 + $0x70] sm:$0xff]  ;;  %v248_v23 = vld [vmem:[#allocation2 + $0x88] sm:$0xff] }
 0x103   :  { %2134 = vmatpush1.bf16.msra.mxu1 %v2133_v12  ;;  %v2009_v21 = vpack.c.bf16 %v243_v19, %v239_v18  ;;  %v252_v24 = vld [vmem:[#allocation2 + $0xa8] sm:$0xff]  ;;  %2008 = vmatprep.subr.bf16.mxu0 %v2007_v16  ;;  %v2137_v25 = vpack.c.bf16 %v245_v22, %v241_v20  ;;  %v250_v27 = vld [vmem:[#allocation2 + $0x98] sm:$0xff]  ;;  %v247_v29 = vld [vmem:[#allocation2 + $0x80] sm:$0xff] }
 0x104   :  { %2136 = vmatprep.subr.bf16.mxu1 %v2135_v17  ;;  %v2011_v26 = vpack.c.bf16 %v252_v24, %v248_v23  ;;  %v254_v28 = vld [vmem:[#allocation2 + $0xb8] sm:$0xff]  ;;  %v251_v31 = vld [vmem:[#allocation2 + $0xa0] sm:$0xff]  ;;  %v249_v32 = vld [vmem:[#allocation2 + $0x90] sm:$0xff] }
 0x105   :  { %v2139_v30 = vpack.c.bf16 %v254_v28, %v250_v27  ;;  %v253_v33 = vld [vmem:[#allocation2 + $0xb0] sm:$0xff]  ;;  %v2013_v34 = vpack.c.bf16 %v251_v31, %v247_v29  ;;  %v256_v35 = vld [vmem:[#allocation2 + $0xc8] sm:$0xff]  ;;  %v258_v37 = vld [vmem:[#allocation2 + $0xd8] sm:$0xff] }
 0x106   :  { %2010 = vmatpush1.bf16.msra.mxu0 %v2009_v21  ;;  %v260_v36 = vld [vmem:[#allocation2 + $0xe8] sm:$0xff]  ;;  %v2141_v38 = vpack.c.bf16 %v253_v33, %v249_v32  ;;  %v262_v40 = vld [vmem:[#allocation2 + $0xf8] sm:$0xff]  ;;  %v255_v41 = vld [vmem:[#allocation2 + $0xc0] sm:$0xff] }
 0x107   :  { %2138 = vmatpush1.bf16.msra.mxu1 %v2137_v25  ;;  %2012 = vmatprep.subr.bf16.mxu0 %v2011_v26  ;;  %v2015_v39 = vpack.c.bf16 %v260_v36, %v256_v35  ;;  %v259_v42 = vld [vmem:[#allocation2 + $0xe0] sm:$0xff]  ;;  %v2143_v43 = vpack.c.bf16 %v262_v40, %v258_v37  ;;  %v257_v44 = vld [vmem:[#allocation2 + $0xd0] sm:$0xff]  ;;  %v264_v46 = vld [vmem:[#allocation2 + $0x108] sm:$0xff] }
 0x108   :  { %2140 = vmatprep.subr.bf16.mxu1 %v2139_v30  ;;  %v261_v45 = vld [vmem:[#allocation2 + $0xf0] sm:$0xff]  ;;  %v268_v47 = vld [vmem:[#allocation2 + $0x128] sm:$0xff]  ;;  %v266_v48 = vld [vmem:[#allocation2 + $0x118] sm:$0xff]  ;;  %v2017_v50 = vpack.c.bf16 %v259_v42, %v255_v41 }
 0x109   :  { %v270_v49 = vld [vmem:[#allocation2 + $0x138] sm:$0xff]  ;;  %v2145_v51 = vpack.c.bf16 %v261_v45, %v257_v44  ;;  %v2019_v52 = vpack.c.bf16 %v268_v47, %v264_v46  ;;  %v263_v53 = vld [vmem:[#allocation2 + $0x100] sm:$0xff]  ;;  %v265_v55 = vld [vmem:[#allocation2 + $0x110] sm:$0xff] }
 0x10a   :  { %2014 = vmatpush1.bf16.msra.mxu0 %v2013_v34  ;;  %v267_v54 = vld [vmem:[#allocation2 + $0x120] sm:$0xff]  ;;  %v2147_v56 = vpack.c.bf16 %v270_v49, %v266_v48  ;;  %v269_v57 = vld [vmem:[#allocation2 + $0x130] sm:$0xff]  ;;  %v272_v58 = vld [vmem:[#allocation2 + $0x148] sm:$0xff] }
 0x10b   :  { %2142 = vmatpush1.bf16.msra.mxu1 %v2141_v38  ;;  %2016 = vmatprep.subr.bf16.mxu0 %v2015_v39  ;;  %v276_v59 = vld [vmem:[#allocation2 + $0x168] sm:$0xff]  ;;  %v274_v60 = vld [vmem:[#allocation2 + $0x158] sm:$0xff]  ;;  %v2021_v62 = vpack.c.bf16 %v267_v54, %v263_v53  ;;  %v2149_v63 = vpack.c.bf16 %v269_v57, %v265_v55  ;;  %v271_v1 = vld [vmem:[#allocation2 + $0x140] sm:$0xff] }
 0x10c   :  { %2144 = vmatprep.subr.bf16.mxu1 %v2143_v43  ;;  %v278_v61 = vld [vmem:[#allocation2 + $0x178] sm:$0xff]  ;;  %v2023_v0 = vpack.c.bf16 %v276_v59, %v272_v58  ;;  %v275_v2 = vld [vmem:[#allocation2 + $0x160] sm:$0xff]  ;;  %v273_v3 = vld [vmem:[#allocation2 + $0x150] sm:$0xff] }
 0x10d   :  { %v2151_v4 = vpack.c.bf16 %v278_v61, %v274_v60  ;;  %v277_v5 = vld [vmem:[#allocation2 + $0x170] sm:$0xff]  ;;  %v280_v6 = vld [vmem:[#allocation2 + $0x188] sm:$0xff]  ;;  %v282_v8 = vld [vmem:[#allocation2 + $0x198] sm:$0xff]  ;;  %v2025_v10 = vpack.c.bf16 %v275_v2, %v271_v1 }
 0x10e   :  { %2018 = vmatpush1.bf16.msra.mxu0 %v2017_v50  ;;  %v284_v7 = vld [vmem:[#allocation2 + $0x1a8] sm:$0xff]  ;;  %v286_v9 = vld [vmem:[#allocation2 + $0x1b8] sm:$0xff]  ;;  %v2153_v11 = vpack.c.bf16 %v277_v5, %v273_v3  ;;  %v279_v13 = vld [vmem:[#allocation2 + $0x180] sm:$0xff] }
 0x10f   :  { %2146 = vmatpush1.bf16.msra.mxu1 %v2145_v51  ;;  %2020 = vmatprep.subr.bf16.mxu0 %v2019_v52  ;;  %v2027_v12 = vpack.c.bf16 %v284_v7, %v280_v6  ;;  %v283_v14 = vld [vmem:[#allocation2 + $0x1a0] sm:$0xff]  ;;  %v281_v15 = vld [vmem:[#allocation2 + $0x190] sm:$0xff]  ;;  %v2155_v16 = vpack.c.bf16 %v286_v9, %v282_v8  ;;  %v288_v18 = vld [vmem:[#allocation2 + $0x1c8] sm:$0xff] }
 0x110   :  { %2148 = vmatprep.subr.bf16.mxu1 %v2147_v56  ;;  %v285_v17 = vld [vmem:[#allocation2 + $0x1b0] sm:$0xff]  ;;  %v292_v19 = vld [vmem:[#allocation2 + $0x1e8] sm:$0xff]  ;;  %v290_v20 = vld [vmem:[#allocation2 + $0x1d8] sm:$0xff]  ;;  %v2029_v22 = vpack.c.bf16 %v283_v14, %v279_v13 }
 0x111   :  { %v294_v21 = vld [vmem:[#allocation2 + $0x1f8] sm:$0xff]  ;;  %v2157_v23 = vpack.c.bf16 %v285_v17, %v281_v15  ;;  %v2031_v24 = vpack.c.bf16 %v292_v19, %v288_v18  ;;  %v287_v25 = vld [vmem:[#allocation2 + $0x1c0] sm:$0xff]  ;;  %v289_v27 = vld [vmem:[#allocation2 + $0x1d0] sm:$0xff] }
 0x112   :  { %2022 = vmatpush1.bf16.msra.mxu0 %v2021_v62  ;;  %v291_v26 = vld [vmem:[#allocation2 + $0x1e0] sm:$0xff]  ;;  %v2159_v28 = vpack.c.bf16 %v294_v21, %v290_v20  ;;  %v293_v29 = vld [vmem:[#allocation2 + $0x1f0] sm:$0xff]  ;;  %v296_v30 = vld [vmem:[#allocation2 + $0x208] sm:$0xff] }
 0x113   :  { %2150 = vmatpush1.bf16.msra.mxu1 %v2149_v63  ;;  %2024 = vmatprep.subr.bf16.mxu0 %v2023_v0  ;;  %v300_v31 = vld [vmem:[#allocation2 + $0x228] sm:$0xff]  ;;  %v298_v32 = vld [vmem:[#allocation2 + $0x218] sm:$0xff]  ;;  %v2033_v34 = vpack.c.bf16 %v291_v26, %v287_v25  ;;  %v2161_v35 = vpack.c.bf16 %v293_v29, %v289_v27  ;;  %v295_v37 = vld [vmem:[#allocation2 + $0x200] sm:$0xff] }
 0x114   :  { %2152 = vmatprep.subr.bf16.mxu1 %v2151_v4  ;;  %v302_v33 = vld [vmem:[#allocation2 + $0x238] sm:$0xff]  ;;  %v2035_v36 = vpack.c.bf16 %v300_v31, %v296_v30  ;;  %v299_v38 = vld [vmem:[#allocation2 + $0x220] sm:$0xff]  ;;  %v297_v39 = vld [vmem:[#allocation2 + $0x210] sm:$0xff] }
 0x115   :  { %v2163_v40 = vpack.c.bf16 %v302_v33, %v298_v32  ;;  %v301_v41 = vld [vmem:[#allocation2 + $0x230] sm:$0xff]  ;;  %v304_v42 = vld [vmem:[#allocation2 + $0x248] sm:$0xff]  ;;  %v306_v44 = vld [vmem:[#allocation2 + $0x258] sm:$0xff]  ;;  %v2037_v46 = vpack.c.bf16 %v299_v38, %v295_v37 }
 0x116   :  { %2026 = vmatpush1.bf16.msra.mxu0 %v2025_v10  ;;  %v308_v43 = vld [vmem:[#allocation2 + $0x268] sm:$0xff]  ;;  %v310_v45 = vld [vmem:[#allocation2 + $0x278] sm:$0xff]  ;;  %v2165_v47 = vpack.c.bf16 %v301_v41, %v297_v39  ;;  %v303_v49 = vld [vmem:[#allocation2 + $0x240] sm:$0xff] }
 0x117   :  { %2154 = vmatpush1.bf16.msra.mxu1 %v2153_v11  ;;  %2028 = vmatprep.subr.bf16.mxu0 %v2027_v12  ;;  %v2039_v48 = vpack.c.bf16 %v308_v43, %v304_v42  ;;  %v307_v50 = vld [vmem:[#allocation2 + $0x260] sm:$0xff]  ;;  %v305_v51 = vld [vmem:[#allocation2 + $0x250] sm:$0xff]  ;;  %v2167_v52 = vpack.c.bf16 %v310_v45, %v306_v44  ;;  %v312_v54 = vld [vmem:[#allocation2 + $0x288] sm:$0xff] }
 0x118   :  { %2156 = vmatprep.subr.bf16.mxu1 %v2155_v16  ;;  %v309_v53 = vld [vmem:[#allocation2 + $0x270] sm:$0xff]  ;;  %v316_v55 = vld [vmem:[#allocation2 + $0x2a8] sm:$0xff]  ;;  %v314_v56 = vld [vmem:[#allocation2 + $0x298] sm:$0xff]  ;;  %v2041_v58 = vpack.c.bf16 %v307_v50, %v303_v49 }
 0x119   :  { %v318_v57 = vld [vmem:[#allocation2 + $0x2b8] sm:$0xff]  ;;  %v2169_v59 = vpack.c.bf16 %v309_v53, %v305_v51  ;;  %v2043_v60 = vpack.c.bf16 %v316_v55, %v312_v54  ;;  %v311_v61 = vld [vmem:[#allocation2 + $0x280] sm:$0xff]  ;;  %v313_v63 = vld [vmem:[#allocation2 + $0x290] sm:$0xff] }
 0x11a   :  { %2030 = vmatpush1.bf16.msra.mxu0 %v2029_v22  ;;  %v315_v62 = vld [vmem:[#allocation2 + $0x2a0] sm:$0xff]  ;;  %v2171_v0 = vpack.c.bf16 %v318_v57, %v314_v56  ;;  %v317_v1 = vld [vmem:[#allocation2 + $0x2b0] sm:$0xff]  ;;  %v320_v2 = vld [vmem:[#allocation2 + $0x2c8] sm:$0xff] }
 0x11b   :  { %2158 = vmatpush1.bf16.msra.mxu1 %v2157_v23  ;;  %2032 = vmatprep.subr.bf16.mxu0 %v2031_v24  ;;  %v324_v3 = vld [vmem:[#allocation2 + $0x2e8] sm:$0xff]  ;;  %v322_v4 = vld [vmem:[#allocation2 + $0x2d8] sm:$0xff]  ;;  %v2045_v6 = vpack.c.bf16 %v315_v62, %v311_v61  ;;  %v319_v7 = vld [vmem:[#allocation2 + $0x2c0] sm:$0xff]  ;;  %v2173_v8 = vpack.c.bf16 %v317_v1, %v313_v63 }
 0x11c   :  { %2160 = vmatprep.subr.bf16.mxu1 %v2159_v28  ;;  %v326_v5 = vld [vmem:[#allocation2 + $0x2f8] sm:$0xff]  ;;  %v2047_v9 = vpack.c.bf16 %v324_v3, %v320_v2  ;;  %v323_v10 = vld [vmem:[#allocation2 + $0x2e0] sm:$0xff]  ;;  %v321_v11 = vld [vmem:[#allocation2 + $0x2d0] sm:$0xff] }
 0x11d   :  { %v325_v12 = vld [vmem:[#allocation2 + $0x2f0] sm:$0xff]  ;;  %v2175_v13 = vpack.c.bf16 %v326_v5, %v322_v4  ;;  %v328_v14 = vld [vmem:[#allocation2 + $0x308] sm:$0xff]  ;;  %v330_v17 = vld [vmem:[#allocation2 + $0x318] sm:$0xff]  ;;  %v2049_v19 = vpack.c.bf16 %v323_v10, %v319_v7 }
 0x11e   :  { %2034 = vmatpush1.bf16.msra.mxu0 %v2033_v34  ;;  %v332_v15 = vld [vmem:[#allocation2 + $0x328] sm:$0xff]  ;;  %v334_v18 = vld [vmem:[#allocation2 + $0x338] sm:$0xff]  ;;  %v2177_v20 = vpack.c.bf16 %v325_v12, %v321_v11  ;;  %v327_v22 = vld [vmem:[#allocation2 + $0x300] sm:$0xff] }
 0x11f   :  { %2162 = vmatpush1.bf16.msra.mxu1 %v2161_v35  ;;  %2036 = vmatprep.subr.bf16.mxu0 %v2035_v36  ;;  %v227_v16 = vld [vmem:[%s3290_s0 + $0x8] sm:$0xff]  ;;  %v2051_v21 = vpack.c.bf16 %v332_v15, %v328_v14  ;;  %v331_v23 = vld [vmem:[#allocation2 + $0x320] sm:$0xff]  ;;  %v329_v24 = vld [vmem:[#allocation2 + $0x310] sm:$0xff]  ;;  %v2179_v25 = vpack.c.bf16 %v334_v18, %v330_v17 }
 0x120   :  { %2164 = vmatprep.subr.bf16.mxu1 %v2163_v40  ;;  %581 = vmatprep.mubr.f32.mxu0 %v227_v16  ;;  %v333_v26 = vld [vmem:[#allocation2 + $0x330] sm:$0xff]  ;;  %v336_v27 = vld [vmem:[#allocation2 + $0x348] sm:$0xff]  ;;  %v338_v29 = vld [vmem:[#allocation2 + $0x358] sm:$0xff]  ;;  %v2053_v31 = vpack.c.bf16 %v331_v23, %v327_v22 }
 0x121   :  { %794 = vmatprep.mubr.f32.mxu1 %v227_v16  ;;  %v340_v28 = vld [vmem:[#allocation2 + $0x368] sm:$0xff]  ;;  %v342_v30 = vld [vmem:[#allocation2 + $0x378] sm:$0xff]  ;;  %v2181_v32 = vpack.c.bf16 %v333_v26, %v329_v24  ;;  %v335_v34 = vld [vmem:[#allocation2 + $0x340] sm:$0xff] }
 0x122   :  { %2038 = vmatpush1.bf16.msra.mxu0 %v2037_v46  ;;  %v2055_v33 = vpack.c.bf16 %v340_v28, %v336_v27  ;;  %v339_v35 = vld [vmem:[#allocation2 + $0x360] sm:$0xff]  ;;  %v337_v36 = vld [vmem:[#allocation2 + $0x350] sm:$0xff]  ;;  %v2183_v37 = vpack.c.bf16 %v342_v30, %v338_v29  ;;  %v344_v39 = vld [vmem:[#allocation2 + $0x388] sm:$0xff] }
 0x123   :  { %2166 = vmatpush1.bf16.msra.mxu1 %v2165_v47  ;;  %2040 = vmatprep.subr.bf16.mxu0 %v2039_v48  ;;  %v341_v38 = vld [vmem:[#allocation2 + $0x370] sm:$0xff]  ;;  %v348_v40 = vld [vmem:[#allocation2 + $0x3a8] sm:$0xff]  ;;  %v346_v41 = vld [vmem:[#allocation2 + $0x398] sm:$0xff]  ;;  %v2057_v43 = vpack.c.bf16 %v339_v35, %v335_v34 }
 0x124   :  { %2168 = vmatprep.subr.bf16.mxu1 %v2167_v52  ;;  %v350_v42 = vld [vmem:[#allocation2 + $0x3b8] sm:$0xff]  ;;  %v2185_v44 = vpack.c.bf16 %v341_v38, %v337_v36  ;;  %v2059_v45 = vpack.c.bf16 %v348_v40, %v344_v39  ;;  %v343_v46 = vld [vmem:[#allocation2 + $0x380] sm:$0xff]  ;;  %v345_v48 = vld [vmem:[#allocation2 + $0x390] sm:$0xff] }
 0x125   :  { %v347_v47 = vld [vmem:[#allocation2 + $0x3a0] sm:$0xff]  ;;  %v2187_v49 = vpack.c.bf16 %v350_v42, %v346_v41  ;;  %v349_v50 = vld [vmem:[#allocation2 + $0x3b0] sm:$0xff]  ;;  %v352_v51 = vld [vmem:[#allocation2 + $0x3c8] sm:$0xff] }
 0x126   :  { %2042 = vmatpush1.bf16.msra.mxu0 %v2041_v58  ;;  %v356_v52 = vld [vmem:[#allocation2 + $0x3e8] sm:$0xff]  ;;  %v354_v53 = vld [vmem:[#allocation2 + $0x3d8] sm:$0xff]  ;;  %v2061_v55 = vpack.c.bf16 %v347_v47, %v343_v46  ;;  %v2189_v56 = vpack.c.bf16 %v349_v50, %v345_v48  ;;  %v351_v58 = vld [vmem:[#allocation2 + $0x3c0] sm:$0xff] }
 0x127   :  { %2170 = vmatpush1.bf16.msra.mxu1 %v2169_v59  ;;  %2044 = vmatprep.subr.bf16.mxu0 %v2043_v60  ;;  %v358_v54 = vld [vmem:[#allocation2 + $0x3f8] sm:$0xff]  ;;  %v2063_v57 = vpack.c.bf16 %v356_v52, %v352_v51  ;;  %v355_v59 = vld [vmem:[#allocation2 + $0x3e0] sm:$0xff]  ;;  %v353_v60 = vld [vmem:[#allocation2 + $0x3d0] sm:$0xff] }
 0x128   :  { %2172 = vmatprep.subr.bf16.mxu1 %v2171_v0  ;;  %v2191_v61 = vpack.c.bf16 %v358_v54, %v354_v53  ;;  %v357_v62 = vld [vmem:[#allocation2 + $0x3f0] sm:$0xff]  ;;  %v360_v63 = vld [vmem:[#allocation2 + $0x408] sm:$0xff]  ;;  %v362_v1 = vld [vmem:[#allocation2 + $0x418] sm:$0xff]  ;;  %v2065_v3 = vpack.c.bf16 %v355_v59, %v351_v58 }
 0x129   :  { %v364_v0 = vld [vmem:[#allocation2 + $0x428] sm:$0xff]  ;;  %v366_v2 = vld [vmem:[#allocation2 + $0x438] sm:$0xff]  ;;  %v2193_v4 = vpack.c.bf16 %v357_v62, %v353_v60  ;;  %v363_v7 = vld [vmem:[#allocation2 + $0x420] sm:$0xff] }
 0x12a   :  { %2046 = vmatpush1.bf16.msra.mxu0 %v2045_v6  ;;  %v2067_v5 = vpack.c.bf16 %v364_v0, %v360_v63  ;;  %v359_v6 = vld [vmem:[#allocation2 + $0x400] sm:$0xff]  ;;  %v365_v10 = vld [vmem:[#allocation2 + $0x430] sm:$0xff]  ;;  %v368_v11 = vld [vmem:[#allocation2 + $0x448] sm:$0xff] }
 0x12b   :  { %2174 = vmatpush1.bf16.msra.mxu1 %v2173_v8  ;;  %2048 = vmatprep.subr.bf16.mxu0 %v2047_v9  ;;  %v361_v8 = vld [vmem:[#allocation2 + $0x410] sm:$0xff]  ;;  %v2195_v9 = vpack.c.bf16 %v366_v2, %v362_v1  ;;  %v372_v12 = vld [vmem:[#allocation2 + $0x468] sm:$0xff]  ;;  %v374_v14 = vld [vmem:[#allocation2 + $0x478] sm:$0xff]  ;;  %v2069_v16 = vpack.c.bf16 %v363_v7, %v359_v6 }
 0x12c   :  { %2176 = vmatprep.subr.bf16.mxu1 %v2175_v13  ;;  %v370_v13 = vld [vmem:[#allocation2 + $0x458] sm:$0xff]  ;;  %v226_v15 = vld [vmem:[%s3290_s0] sm:$0xff]  ;;  %v2197_v17 = vpack.c.bf16 %v365_v10, %v361_v8  ;;  %v2071_v18 = vpack.c.bf16 %v372_v12, %v368_v11  ;;  %v373_v23 = vld [vmem:[#allocation2 + $0x470] sm:$0xff] }
 0x12d   :  { %v2199_v22 = vpack.c.bf16 %v374_v14, %v370_v13  ;;  %v376_v24 = vld [vmem:[#allocation2 + $0x488] sm:$0xff]  ;;  %v378_v26 = vld [vmem:[#allocation2 + $0x498] sm:$0xff]  ;;  %v381_v35 = vld [vmem:[#allocation2 + $0x4b0] sm:$0xff] }
 0x12e   :  { %2050 = vmatpush1.bf16.msra.mxu0 %v2049_v19  ;;  %v367_v19 = vld [vmem:[#allocation2 + $0x440] sm:$0xff]  ;;  %v382_v27 = vld [vmem:[#allocation2 + $0x4b8] sm:$0xff]  ;;  %v384_v36 = vld [vmem:[#allocation2 + $0x4c8] sm:$0xff] }
 0x12f   :  { %2178 = vmatpush1.bf16.msra.mxu1 %v2177_v20  ;;  %2052 = vmatprep.subr.bf16.mxu0 %v2051_v21  ;;  %v371_v20 = vld [vmem:[#allocation2 + $0x460] sm:$0xff]  ;;  %v369_v21 = vld [vmem:[#allocation2 + $0x450] sm:$0xff]  ;;  %v2203_v34 = vpack.c.bf16 %v382_v27, %v378_v26  ;;  %v386_v38 = vld [vmem:[#allocation2 + $0x4d8] sm:$0xff] }
 0x130   :  { %2180 = vmatprep.subr.bf16.mxu1 %v2179_v25  ;;  %v380_v25 = vld [vmem:[#allocation2 + $0x4a8] sm:$0xff]  ;;  %v2073_v28 = vpack.c.bf16 %v371_v20, %v367_v19  ;;  %v2201_v29 = vpack.c.bf16 %v373_v23, %v369_v21  ;;  %v390_v39 = vld [vmem:[#allocation2 + $0x4f8] sm:$0xff]  ;;  %v389_v47 = vld [vmem:[#allocation2 + $0x4f0] sm:$0xff] }
 0x131   :  { %v2075_v30 = vpack.c.bf16 %v380_v25, %v376_v24  ;;  %v2207_v46 = vpack.c.bf16 %v390_v39, %v386_v38  ;;  %v392_v48 = vld [vmem:[#allocation2 + $0x508] sm:$0xff]  ;;  %v394_v50 = vld [vmem:[#allocation2 + $0x518] sm:$0xff]  ;;  %v397_v59 = vld [vmem:[#allocation2 + $0x530] sm:$0xff] }
 0x132   :  { %2054 = vmatpush1.bf16.msra.mxu0 %v2053_v31  ;;  %v375_v31 = vld [vmem:[#allocation2 + $0x480] sm:$0xff]  ;;  %v398_v51 = vld [vmem:[#allocation2 + $0x538] sm:$0xff]  ;;  %v400_v60 = vld [vmem:[#allocation2 + $0x548] sm:$0xff] }
 0x133   :  { %2182 = vmatpush1.bf16.msra.mxu1 %v2181_v32  ;;  %2056 = vmatprep.subr.bf16.mxu0 %v2055_v33  ;;  %v379_v32 = vld [vmem:[#allocation2 + $0x4a0] sm:$0xff]  ;;  %v377_v33 = vld [vmem:[#allocation2 + $0x490] sm:$0xff]  ;;  %v2211_v58 = vpack.c.bf16 %v398_v51, %v394_v50  ;;  %v402_v62 = vld [vmem:[#allocation2 + $0x558] sm:$0xff] }
 0x134   :  { %2184 = vmatprep.subr.bf16.mxu1 %v2183_v37  ;;  %v388_v37 = vld [vmem:[#allocation2 + $0x4e8] sm:$0xff]  ;;  %v2077_v40 = vpack.c.bf16 %v379_v32, %v375_v31  ;;  %v2205_v41 = vpack.c.bf16 %v381_v35, %v377_v33  ;;  %v406_v63 = vld [vmem:[#allocation2 + $0x578] sm:$0xff]  ;;  %v405_v7 = vld [vmem:[#allocation2 + $0x570] sm:$0xff] }
 0x135   :  { %v2079_v42 = vpack.c.bf16 %v388_v37, %v384_v36  ;;  %v2215_v6 = vpack.c.bf16 %v406_v63, %v402_v62  ;;  %v408_v8 = vld [vmem:[#allocation2 + $0x588] sm:$0xff]  ;;  %v410_v10 = vld [vmem:[#allocation2 + $0x598] sm:$0xff]  ;;  %v407_v13 = vld [vmem:[#allocation2 + $0x580] sm:$0xff] }
 0x136   :  { %2058 = vmatpush1.bf16.msra.mxu0 %v2057_v43  ;;  %v383_v43 = vld [vmem:[#allocation2 + $0x4c0] sm:$0xff]  ;;  %v414_v11 = vld [vmem:[#allocation2 + $0x5b8] sm:$0xff]  ;;  %v416_v20 = vld [vmem:[#allocation2 + $0x5c8] sm:$0xff] }
 0x137   :  { %2186 = vmatpush1.bf16.msra.mxu1 %v2185_v44  ;;  %2060 = vmatprep.subr.bf16.mxu0 %v2059_v45  ;;  %v387_v44 = vld [vmem:[#allocation2 + $0x4e0] sm:$0xff]  ;;  %v385_v45 = vld [vmem:[#allocation2 + $0x4d0] sm:$0xff]  ;;  %v2219_v19 = vpack.c.bf16 %v414_v11, %v410_v10  ;;  %v420_v21 = vld [vmem:[#allocation2 + $0x5e8] sm:$0xff] }
 0x138   :  { %2188 = vmatprep.subr.bf16.mxu1 %v2187_v49  ;;  %v396_v49 = vld [vmem:[#allocation2 + $0x528] sm:$0xff]  ;;  %v2081_v52 = vpack.c.bf16 %v387_v44, %v383_v43  ;;  %v2209_v53 = vpack.c.bf16 %v389_v47, %v385_v45  ;;  %v418_v23 = vld [vmem:[#allocation2 + $0x5d8] sm:$0xff]  ;;  %v2095_v27 = vpack.c.bf16 %v420_v21, %v416_v20  ;;  %v421_v32 = vld [vmem:[#allocation2 + $0x5f0] sm:$0xff] }
 0x139   :  { %v2083_v54 = vpack.c.bf16 %v396_v49, %v392_v48  ;;  %v422_v24 = vld [vmem:[#allocation2 + $0x5f8] sm:$0xff]  ;;  %v424_v33 = vld [vmem:[#allocation2 + $0x608] sm:$0xff]  ;;  %v429_v44 = vld [vmem:[#allocation2 + $0x630] sm:$0xff] }
 0x13a   :  { %2062 = vmatpush1.bf16.msra.mxu0 %v2061_v55  ;;  %v391_v55 = vld [vmem:[#allocation2 + $0x500] sm:$0xff]  ;;  %v2223_v31 = vpack.c.bf16 %v422_v24, %v418_v23  ;;  %v426_v35 = vld [vmem:[#allocation2 + $0x618] sm:$0xff]  ;;  %v432_v45 = vld [vmem:[#allocation2 + $0x648] sm:$0xff] }
 0x13b   :  { %2190 = vmatpush1.bf16.msra.mxu1 %v2189_v56  ;;  %2064 = vmatprep.subr.bf16.mxu0 %v2063_v57  ;;  %v395_v56 = vld [vmem:[#allocation2 + $0x520] sm:$0xff]  ;;  %v393_v57 = vld [vmem:[#allocation2 + $0x510] sm:$0xff]  ;;  %v430_v36 = vld [vmem:[#allocation2 + $0x638] sm:$0xff] }
 0x13c   :  { %2192 = vmatprep.subr.bf16.mxu1 %v2191_v61  ;;  %v404_v61 = vld [vmem:[#allocation2 + $0x568] sm:$0xff]  ;;  %v2085_v0 = vpack.c.bf16 %v395_v56, %v391_v55  ;;  %v2213_v1 = vpack.c.bf16 %v397_v59, %v393_v57  ;;  %v2227_v43 = vpack.c.bf16 %v430_v36, %v426_v35  ;;  %v434_v47 = vld [vmem:[#allocation2 + $0x658] sm:$0xff]  ;;  %v437_v56 = vld [vmem:[#allocation2 + $0x670] sm:$0xff] }
 0x13d   :  { %v2087_v2 = vpack.c.bf16 %v404_v61, %v400_v60  ;;  %v438_v48 = vld [vmem:[#allocation2 + $0x678] sm:$0xff]  ;;  %v440_v57 = vld [vmem:[#allocation2 + $0x688] sm:$0xff]  ;;  %v455_v24 = vld [vmem:[#allocation2 + $0x700] sm:$0xff] }
 0x13e   :  { %2066 = vmatpush1.bf16.msra.mxu0 %v2065_v3  ;;  %v399_v3 = vld [vmem:[#allocation2 + $0x540] sm:$0xff]  ;;  %v2231_v55 = vpack.c.bf16 %v438_v48, %v434_v47  ;;  %v442_v59 = vld [vmem:[#allocation2 + $0x698] sm:$0xff] }
 0x13f   :  { %2194 = vmatpush1.bf16.msra.mxu1 %v2193_v4  ;;  %2068 = vmatprep.subr.bf16.mxu0 %v2067_v5  ;;  %v403_v4 = vld [vmem:[#allocation2 + $0x560] sm:$0xff]  ;;  %v401_v5 = vld [vmem:[#allocation2 + $0x550] sm:$0xff]  ;;  %v446_v60 = vld [vmem:[#allocation2 + $0x6b8] sm:$0xff] }
 0x140   :  { %2196 = vmatprep.subr.bf16.mxu1 %v2195_v9  ;;  %v412_v9 = vld [vmem:[#allocation2 + $0x5a8] sm:$0xff]  ;;  %v2089_v12 = vpack.c.bf16 %v403_v4, %v399_v3  ;;  %v2217_v14 = vpack.c.bf16 %v405_v7, %v401_v5  ;;  %v2235_v3 = vpack.c.bf16 %v446_v60, %v442_v59  ;;  %v445_v4 = vld [vmem:[#allocation2 + $0x6b0] sm:$0xff]  ;;  %v450_v7 = vld [vmem:[#allocation2 + $0x6d8] sm:$0xff] }
 0x141   :  { %582 = vmatmul.mubr.f32.vlgmr.msra.gmra.mrb[0].mxu0 %v226_v15  ;;  %v448_v5 = vld [vmem:[#allocation2 + $0x6c8] sm:$0xff]  ;;  %v462_v20 = vld [vmem:[#allocation2 + $0x738] sm:$0xff]  ;;  %v463_v36 = vld [vmem:[#allocation2 + $0x740] sm:$0xff] }
 0x142   :  { %2070 = vmatpush1.bf16.msra.mxu0 %v2069_v16  ;;  %795 = vmatmul.mubr.f32.vlgmr.msra.gmra.mrb[0].mxu1 %v226_v15  ;;  %v2091_v15 = vpack.c.bf16 %v412_v9, %v408_v8  ;;  %v411_v16 = vld [vmem:[#allocation2 + $0x5a0] sm:$0xff]  ;;  %v454_v8 = vld [vmem:[#allocation2 + $0x6f8] sm:$0xff] }
 0x143   :  { %2198 = vmatpush1.bf16.msra.mxu1 %v2197_v17  ;;  %2072 = vmatprep.subr.bf16.mxu0 %v2071_v18  ;;  %v409_v17 = vld [vmem:[#allocation2 + $0x590] sm:$0xff]  ;;  %v2093_v25 = vpack.c.bf16 %v411_v16, %v407_v13  ;;  %v451_v13 = vld [vmem:[#allocation2 + $0x6e0] sm:$0xff] }
 0x144   :  { %2200 = vmatprep.subr.bf16.mxu1 %v2199_v22  ;;  %v413_v18 = vld [vmem:[#allocation2 + $0x5b0] sm:$0xff]  ;;  %v229_v22 = vld [vmem:[%s3290_s0 + $0x18] sm:$0xff]  ;;  %v471_v48 = vld [vmem:[#allocation2 + $0x780] sm:$0xff] }
 0x145   :  { %652 = vmatprep.mubr.f32.mxu0 %v229_v22  ;;  %865 = vmatprep.mubr.f32.mxu1 %v229_v22  ;;  %v2221_v26 = vpack.c.bf16 %v413_v18, %v409_v17  ;;  %v453_v16 = vld [vmem:[#allocation2 + $0x6f0] sm:$0xff]  ;;  %v456_v17 = vld [vmem:[#allocation2 + $0x708] sm:$0xff]  ;;  %v479_v60 = vld [vmem:[#allocation2 + $0x7c0] sm:$0xff] }
 0x146   :  { %2074 = vmatpush1.bf16.msra.mxu0 %v2073_v28  ;;  %v415_v28 = vld [vmem:[#allocation2 + $0x5c0] sm:$0xff]  ;;  %v460_v18 = vld [vmem:[#allocation2 + $0x728] sm:$0xff] }
 0x147   :  { %2202 = vmatpush1.bf16.msra.mxu1 %v2201_v29  ;;  %2076 = vmatprep.subr.bf16.mxu0 %v2075_v30  ;;  %v419_v29 = vld [vmem:[#allocation2 + $0x5e0] sm:$0xff]  ;;  %v417_v30 = vld [vmem:[#allocation2 + $0x5d0] sm:$0xff]  ;;  %v2115_v23 = vpack.c.bf16 %v460_v18, %v456_v17 }
 0x148   :  { %2204 = vmatprep.subr.bf16.mxu1 %v2203_v34  ;;  %v428_v34 = vld [vmem:[#allocation2 + $0x628] sm:$0xff]  ;;  %v2097_v37 = vpack.c.bf16 %v419_v29, %v415_v28  ;;  %v2225_v38 = vpack.c.bf16 %v421_v32, %v417_v30  ;;  %v461_v28 = vld [vmem:[#allocation2 + $0x730] sm:$0xff]  ;;  %v470_v32 = vld [vmem:[#allocation2 + $0x778] sm:$0xff] }
 0x149   :  { %v2099_v39 = vpack.c.bf16 %v428_v34, %v424_v33  ;;  %v464_v29 = vld [vmem:[#allocation2 + $0x748] sm:$0xff] }
 0x14a   :  { %2078 = vmatpush1.bf16.msra.mxu0 %v2077_v40  ;;  %v423_v40 = vld [vmem:[#allocation2 + $0x600] sm:$0xff]  ;;  %v468_v30 = vld [vmem:[#allocation2 + $0x768] sm:$0xff] }
 0x14b   :  { %2206 = vmatpush1.bf16.msra.mxu1 %v2205_v41  ;;  %2080 = vmatprep.subr.bf16.mxu0 %v2079_v42  ;;  %v427_v41 = vld [vmem:[#allocation2 + $0x620] sm:$0xff]  ;;  %v425_v42 = vld [vmem:[#allocation2 + $0x610] sm:$0xff]  ;;  %v2119_v35 = vpack.c.bf16 %v468_v30, %v464_v29 }
 0x14c   :  { %2208 = vmatprep.subr.bf16.mxu1 %v2207_v46  ;;  %v436_v46 = vld [vmem:[#allocation2 + $0x668] sm:$0xff]  ;;  %v2101_v49 = vpack.c.bf16 %v427_v41, %v423_v40  ;;  %v2229_v50 = vpack.c.bf16 %v429_v44, %v425_v42  ;;  %v469_v40 = vld [vmem:[#allocation2 + $0x770] sm:$0xff]  ;;  %v478_v44 = vld [vmem:[#allocation2 + $0x7b8] sm:$0xff] }
 0x14d   :  { %v2103_v51 = vpack.c.bf16 %v436_v46, %v432_v45  ;;  %v472_v41 = vld [vmem:[#allocation2 + $0x788] sm:$0xff] }
 0x14e   :  { %2082 = vmatpush1.bf16.msra.mxu0 %v2081_v52  ;;  %v431_v52 = vld [vmem:[#allocation2 + $0x640] sm:$0xff]  ;;  %v476_v42 = vld [vmem:[#allocation2 + $0x7a8] sm:$0xff] }
 0x14f   :  { %2210 = vmatpush1.bf16.msra.mxu1 %v2209_v53  ;;  %2084 = vmatprep.subr.bf16.mxu0 %v2083_v54  ;;  %v435_v53 = vld [vmem:[#allocation2 + $0x660] sm:$0xff]  ;;  %v433_v54 = vld [vmem:[#allocation2 + $0x650] sm:$0xff]  ;;  %v2123_v47 = vpack.c.bf16 %v476_v42, %v472_v41 }
 0x150   :  { %2212 = vmatprep.subr.bf16.mxu1 %v2211_v58  ;;  %v444_v58 = vld [vmem:[#allocation2 + $0x6a8] sm:$0xff]  ;;  %v2105_v61 = vpack.c.bf16 %v435_v53, %v431_v52  ;;  %v2233_v62 = vpack.c.bf16 %v437_v56, %v433_v54  ;;  %v477_v52 = vld [vmem:[#allocation2 + $0x7b0] sm:$0xff]  ;;  %v486_v56 = vld [vmem:[#allocation2 + $0x7f8] sm:$0xff] }
 0x151   :  { %v2107_v63 = vpack.c.bf16 %v444_v58, %v440_v57  ;;  %v480_v53 = vld [vmem:[#allocation2 + $0x7c8] sm:$0xff] }
 0x152   :  { %2086 = vmatpush1.bf16.msra.mxu0 %v2085_v0  ;;  %v439_v0 = vld [vmem:[#allocation2 + $0x680] sm:$0xff]  ;;  %v484_v54 = vld [vmem:[#allocation2 + $0x7e8] sm:$0xff] }
 0x153   :  { %2214 = vmatpush1.bf16.msra.mxu1 %v2213_v1  ;;  %2088 = vmatprep.subr.bf16.mxu0 %v2087_v2  ;;  %v443_v1 = vld [vmem:[#allocation2 + $0x6a0] sm:$0xff]  ;;  %v441_v2 = vld [vmem:[#allocation2 + $0x690] sm:$0xff]  ;;  %v2127_v59 = vpack.c.bf16 %v484_v54, %v480_v53 }
 0x154   :  { %2216 = vmatprep.subr.bf16.mxu1 %v2215_v6  ;;  %v452_v6 = vld [vmem:[#allocation2 + $0x6e8] sm:$0xff]  ;;  %v2109_v9 = vpack.c.bf16 %v443_v1, %v439_v0  ;;  %v2237_v10 = vpack.c.bf16 %v445_v4, %v441_v2  ;;  %v485_v0 = vld [vmem:[#allocation2 + $0x7f0] sm:$0xff]  ;;  %v490_v4 = vld [vmem:[#allocation2 + $0x818] sm:$0xff] }
 0x155   :  { %v2111_v11 = vpack.c.bf16 %v452_v6, %v448_v5  ;;  %v956_v5 = vld [vmem:[#allocation6 + $0x8] sm:$0xff]  ;;  %v958_v6 = vld [vmem:[#allocation6 + $0x18] sm:$0xff] }
 0x156   :  { %2090 = vmatpush1.bf16.msra.mxu0 %v2089_v12  ;;  %v447_v12 = vld [vmem:[#allocation2 + $0x6c0] sm:$0xff] }
 0x157   :  { %2218 = vmatpush1.bf16.msra.mxu1 %v2217_v14  ;;  %2092 = vmatprep.subr.bf16.mxu0 %v2091_v15  ;;  %v449_v14 = vld [vmem:[#allocation2 + $0x6d0] sm:$0xff]  ;;  %v2239_v15 = vpack.c.bf16 %v454_v8, %v450_v7  ;;  %v2113_v21 = vpack.c.bf16 %v451_v13, %v447_v12  ;;  %v487_v8 = vld [vmem:[#allocation2 + $0x800] sm:$0xff] }
 0x158   :  { %2220 = vmatprep.subr.bf16.mxu1 %v2219_v19  ;;  %v458_v19 = vld [vmem:[#allocation2 + $0x718] sm:$0xff]  ;;  %v2241_v22 = vpack.c.bf16 %v453_v16, %v449_v14  ;;  %v228_v7 = vld [vmem:[%s3290_s0 + $0x10] sm:$0xff]  ;;  %v955_v12 = vld [vmem:[#allocation6] sm:$0xff] }
 0x159   :  { %v957_v13 = vld [vmem:[#allocation6 + $0x10] sm:$0xff]  ;;  %v960_v14 = vld [vmem:[#allocation6 + $0x28] sm:$0xff]  ;;  %v230_v16 = vld [vmem:[%s3290_s0 + $0x20] sm:$0xff] }
 0x15a   :  { %2094 = vmatpush1.bf16.msra.mxu0 %v2093_v25  ;;  %v459_v25 = vld [vmem:[#allocation2 + $0x720] sm:$0xff]  ;;  %v2261_v17 = vpack.c.bf16 %v957_v13, %v955_v12  ;;  %v1000_v12 = vld [vmem:[#allocation6 + $0x168] sm:$0xff] }
 0x15b   :  { %2222 = vmatpush1.bf16.msra.mxu1 %v2221_v26  ;;  %2096 = vmatprep.subr.bf16.mxu0 %v2095_v27  ;;  %v457_v26 = vld [vmem:[#allocation2 + $0x710] sm:$0xff]  ;;  %v2243_v27 = vpack.c.bf16 %v462_v20, %v458_v19  ;;  %v2117_v33 = vpack.c.bf16 %v459_v25, %v455_v24  ;;  %v959_v19 = vld [vmem:[#allocation6 + $0x20] sm:$0xff]  ;;  %v1002_v13 = vld [vmem:[#allocation6 + $0x178] sm:$0xff] }
 0x15c   :  { %2224 = vmatprep.subr.bf16.mxu1 %v2223_v31  ;;  %v466_v31 = vld [vmem:[#allocation2 + $0x758] sm:$0xff]  ;;  %v2245_v34 = vpack.c.bf16 %v461_v28, %v457_v26  ;;  %v963_v25 = vld [vmem:[#allocation6 + $0x40] sm:$0xff] }
 0x15d   :  { %v961_v20 = vld [vmem:[#allocation6 + $0x30] sm:$0xff]  ;;  %v970_v28 = vld [vmem:[#allocation6 + $0x78] sm:$0xff] }
 0x15e   :  { %2098 = vmatpush1.bf16.msra.mxu0 %v2097_v37  ;;  %v467_v37 = vld [vmem:[#allocation2 + $0x760] sm:$0xff]  ;;  %v965_v26 = vld [vmem:[#allocation6 + $0x50] sm:$0xff] }
 0x15f   :  { %2226 = vmatpush1.bf16.msra.mxu1 %v2225_v38  ;;  %2100 = vmatprep.subr.bf16.mxu0 %v2099_v39  ;;  %v465_v38 = vld [vmem:[#allocation2 + $0x750] sm:$0xff]  ;;  %v2247_v39 = vpack.c.bf16 %v470_v32, %v466_v31  ;;  %v2121_v45 = vpack.c.bf16 %v467_v37, %v463_v36  ;;  %v2269_v29 = vpack.c.bf16 %v965_v26, %v963_v25  ;;  %v967_v31 = vld [vmem:[#allocation6 + $0x60] sm:$0xff]  ;;  %v1010_v25 = vld [vmem:[#allocation6 + $0x1b8] sm:$0xff] }
 0x160   :  { %2228 = vmatprep.subr.bf16.mxu1 %v2227_v43  ;;  %v474_v43 = vld [vmem:[#allocation2 + $0x798] sm:$0xff]  ;;  %v2249_v46 = vpack.c.bf16 %v469_v40, %v465_v38  ;;  %v971_v37 = vld [vmem:[#allocation6 + $0x80] sm:$0xff] }
 0x161   :  { %v969_v32 = vld [vmem:[#allocation6 + $0x70] sm:$0xff]  ;;  %v978_v40 = vld [vmem:[#allocation6 + $0xb8] sm:$0xff] }
 0x162   :  { %2102 = vmatpush1.bf16.msra.mxu0 %v2101_v49  ;;  %v475_v49 = vld [vmem:[#allocation2 + $0x7a0] sm:$0xff]  ;;  %v973_v38 = vld [vmem:[#allocation6 + $0x90] sm:$0xff] }
 0x163   :  { %2230 = vmatpush1.bf16.msra.mxu1 %v2229_v50  ;;  %2104 = vmatprep.subr.bf16.mxu0 %v2103_v51  ;;  %v473_v50 = vld [vmem:[#allocation2 + $0x790] sm:$0xff]  ;;  %v2251_v51 = vpack.c.bf16 %v478_v44, %v474_v43  ;;  %v2125_v57 = vpack.c.bf16 %v475_v49, %v471_v48  ;;  %v2277_v41 = vpack.c.bf16 %v973_v38, %v971_v37  ;;  %v975_v43 = vld [vmem:[#allocation6 + $0xa0] sm:$0xff]  ;;  %v1018_v38 = vld [vmem:[#allocation6 + $0x1f8] sm:$0xff] }
 0x164   :  { %2232 = vmatprep.subr.bf16.mxu1 %v2231_v55  ;;  %v482_v55 = vld [vmem:[#allocation2 + $0x7d8] sm:$0xff]  ;;  %v2253_v58 = vpack.c.bf16 %v477_v52, %v473_v50  ;;  %v979_v49 = vld [vmem:[#allocation6 + $0xc0] sm:$0xff]  ;;  %v1016_v37 = vld [vmem:[#allocation6 + $0x1e8] sm:$0xff] }
 0x165   :  { %v977_v44 = vld [vmem:[#allocation6 + $0xb0] sm:$0xff]  ;;  %v986_v52 = vld [vmem:[#allocation6 + $0xf8] sm:$0xff] }
 0x166   :  { %2106 = vmatpush1.bf16.msra.mxu0 %v2105_v61  ;;  %v483_v61 = vld [vmem:[#allocation2 + $0x7e0] sm:$0xff]  ;;  %v981_v50 = vld [vmem:[#allocation6 + $0xd0] sm:$0xff] }
 0x167   :  { %2234 = vmatpush1.bf16.msra.mxu1 %v2233_v62  ;;  %2108 = vmatprep.subr.bf16.mxu0 %v2107_v63  ;;  %v2255_v62 = vpack.c.bf16 %v486_v56, %v482_v55  ;;  %v481_v63 = vld [vmem:[#allocation2 + $0x7d0] sm:$0xff]  ;;  %v2129_v1 = vpack.c.bf16 %v483_v61, %v479_v60  ;;  %v2285_v53 = vpack.c.bf16 %v981_v50, %v979_v49  ;;  %v983_v55 = vld [vmem:[#allocation6 + $0xe0] sm:$0xff] }
 0x168   :  { %2236 = vmatprep.subr.bf16.mxu1 %v2235_v3  ;;  %v2257_v2 = vpack.c.bf16 %v485_v0, %v481_v63  ;;  %v488_v3 = vld [vmem:[#allocation2 + $0x808] sm:$0xff]  ;;  %v985_v56 = vld [vmem:[#allocation6 + $0xf0] sm:$0xff]  ;;  %v994_v0 = vld [vmem:[#allocation6 + $0x138] sm:$0xff] }
 0x169   :  { %v987_v61 = vld [vmem:[#allocation6 + $0x100] sm:$0xff]  ;;  %v992_v63 = vld [vmem:[#allocation6 + $0x128] sm:$0xff]  ;;  %v1245_v50 = vld [vmem:[#allocation9 + $0x10] sm:$0xff] }
 0x16a   :  { %2110 = vmatpush1.bf16.msra.mxu0 %v2109_v9  ;;  %v489_v9 = vld [vmem:[#allocation2 + $0x810] sm:$0xff] }
 0x16b   :  { %2238 = vmatpush1.bf16.msra.mxu1 %v2237_v10  ;;  %2112 = vmatprep.subr.bf16.mxu0 %v2111_v11  ;;  %v2259_v10 = vpack.c.bf16 %v958_v6, %v956_v5  ;;  %v2938_v11 = vmov 0.0   ;;  %v996_v5 = vld [vmem:[#allocation6 + $0x148] sm:$0xff]  ;;  %v998_v6 = vld [vmem:[#allocation6 + $0x158] sm:$0xff] }
 0x16c   :  { %2240 = vmatprep.subr.bf16.mxu1 %v2239_v15  ;;  %v962_v15 = vld [vmem:[#allocation6 + $0x38] sm:$0xff] }
 0x16d   :  { %v2263_v18 = vpack.c.bf16 %v962_v15, %v960_v14  ;;  %v2303_v15 = vpack.c.bf16 %v1002_v13, %v1000_v12  ;;  %v1264_v12 = vld [vmem:[#allocation9 + $0xa8] sm:$0xff]  ;;  %v1266_v13 = vld [vmem:[#allocation9 + $0xb8] sm:$0xff] }
 0x16e   :  { %2114 = vmatpush1.bf16.msra.mxu0 %v2113_v21  ;;  %v964_v21 = vld [vmem:[#allocation6 + $0x48] sm:$0xff] }
 0x16f   :  { %2242 = vmatpush1.bf16.msra.mxu1 %v2241_v22  ;;  %2116 = vmatprep.subr.bf16.mxu0 %v2115_v23  ;;  %v966_v22 = vld [vmem:[#allocation6 + $0x58] sm:$0xff]  ;;  %v2265_v23 = vpack.c.bf16 %v961_v20, %v959_v19 }
 0x170   :  { %2244 = vmatprep.subr.bf16.mxu1 %v2243_v27  ;;  %v2267_v24 = vpack.c.bf16 %v966_v22, %v964_v21  ;;  %v968_v27 = vld [vmem:[#allocation6 + $0x68] sm:$0xff]  ;;  %v1006_v19 = vld [vmem:[#allocation6 + $0x198] sm:$0xff]  ;;  %v1003_v22 = vld [vmem:[#allocation6 + $0x180] sm:$0xff] }
 0x171   :  { %v2271_v30 = vpack.c.bf16 %v970_v28, %v968_v27  ;;  %v1007_v28 = vld [vmem:[#allocation6 + $0x1a0] sm:$0xff] }
 0x172   :  { %2118 = vmatpush1.bf16.msra.mxu0 %v2117_v33  ;;  %v972_v33 = vld [vmem:[#allocation6 + $0x88] sm:$0xff] }
 0x173   :  { %2246 = vmatpush1.bf16.msra.mxu1 %v2245_v34  ;;  %2120 = vmatprep.subr.bf16.mxu0 %v2119_v35  ;;  %v974_v34 = vld [vmem:[#allocation6 + $0x98] sm:$0xff]  ;;  %v2273_v35 = vpack.c.bf16 %v969_v32, %v967_v31 }
 0x174   :  { %2248 = vmatprep.subr.bf16.mxu1 %v2247_v39  ;;  %v2275_v36 = vpack.c.bf16 %v974_v34, %v972_v33  ;;  %v976_v39 = vld [vmem:[#allocation6 + $0xa8] sm:$0xff]  ;;  %v1014_v31 = vld [vmem:[#allocation6 + $0x1d8] sm:$0xff]  ;;  %v1011_v34 = vld [vmem:[#allocation6 + $0x1c0] sm:$0xff] }
 0x175   :  { %v2279_v42 = vpack.c.bf16 %v978_v40, %v976_v39  ;;  %v2319_v39 = vpack.c.bf16 %v1018_v38, %v1016_v37  ;;  %v1015_v40 = vld [vmem:[#allocation6 + $0x1e0] sm:$0xff] }
 0x176   :  { %2122 = vmatpush1.bf16.msra.mxu0 %v2121_v45  ;;  %v980_v45 = vld [vmem:[#allocation6 + $0xc8] sm:$0xff]  ;;  %v1282_v37 = vld [vmem:[#allocation9 + $0x138] sm:$0xff] }
 0x177   :  { %2250 = vmatpush1.bf16.msra.mxu1 %v2249_v46  ;;  %2124 = vmatprep.subr.bf16.mxu0 %v2123_v47  ;;  %v982_v46 = vld [vmem:[#allocation6 + $0xd8] sm:$0xff]  ;;  %v2281_v47 = vpack.c.bf16 %v977_v44, %v975_v43  ;;  %v1020_v43 = vld [vmem:[#allocation6 + $0x208] sm:$0xff] }
 0x178   :  { %2252 = vmatprep.subr.bf16.mxu1 %v2251_v51  ;;  %v2283_v48 = vpack.c.bf16 %v982_v46, %v980_v45  ;;  %v984_v51 = vld [vmem:[#allocation6 + $0xe8] sm:$0xff]  ;;  %v1022_v44 = vld [vmem:[#allocation6 + $0x218] sm:$0xff] }
 0x179   :  { %v2287_v54 = vpack.c.bf16 %v986_v52, %v984_v51  ;;  %v2323_v45 = vpack.c.bf16 %v1022_v44, %v1020_v43  ;;  %v1244_v46 = vld [vmem:[#allocation9 + $0x8] sm:$0xff]  ;;  %v1250_v52 = vld [vmem:[#allocation9 + $0x38] sm:$0xff] }
 0x17a   :  { %2126 = vmatpush1.bf16.msra.mxu0 %v2125_v57  ;;  %v988_v57 = vld [vmem:[#allocation6 + $0x108] sm:$0xff]  ;;  %v1286_v43 = vld [vmem:[#allocation9 + $0x158] sm:$0xff] }
 0x17b   :  { %2254 = vmatpush1.bf16.msra.mxu1 %v2253_v58  ;;  %2128 = vmatprep.subr.bf16.mxu0 %v2127_v59  ;;  %v990_v58 = vld [vmem:[#allocation6 + $0x118] sm:$0xff]  ;;  %v2289_v59 = vpack.c.bf16 %v985_v56, %v983_v55  ;;  %v1248_v51 = vld [vmem:[#allocation9 + $0x28] sm:$0xff]  ;;  %v1247_v55 = vld [vmem:[#allocation9 + $0x20] sm:$0xff] }
 0x17c   :  { %2256 = vmatprep.subr.bf16.mxu1 %v2255_v62  ;;  %v2291_v60 = vpack.c.bf16 %v990_v58, %v988_v57  ;;  %v989_v62 = vld [vmem:[#allocation6 + $0x110] sm:$0xff]  ;;  %v1254_v58 = vld [vmem:[#allocation9 + $0x58] sm:$0xff] }
 0x17d   :  { %v1249_v56 = vld [vmem:[#allocation9 + $0x30] sm:$0xff]  ;;  %v1252_v57 = vld [vmem:[#allocation9 + $0x48] sm:$0xff] }
 0x17e   :  { %2130 = vmatpush1.bf16.msra.mxu0 %v2129_v1  ;;  %v2293_v1 = vpack.c.bf16 %v989_v62, %v987_v61  ;;  %v1251_v61 = vld [vmem:[#allocation9 + $0x40] sm:$0xff]  ;;  %v1253_v62 = vld [vmem:[#allocation9 + $0x50] sm:$0xff] }
 0x17f   :  { %2258 = vmatpush1.bf16.msra.mxu1 %v2257_v2  ;;  %659 = vmatprep.subr.mxu0 %v488_v3  ;;  %v2295_v2 = vpack.c.bf16 %v994_v0, %v992_v63  ;;  %v991_v3 = vld [vmem:[#allocation6 + $0x120] sm:$0xff]  ;;  %v1256_v63 = vld [vmem:[#allocation9 + $0x68] sm:$0xff] }
 0x180   :  { %872 = vmatprep.subr.mxu1 %v490_v4  ;;  %v993_v4 = vld [vmem:[#allocation6 + $0x130] sm:$0xff]  ;;  %v1258_v0 = vld [vmem:[#allocation9 + $0x78] sm:$0xff] }
 0x181   :  { %653 = vmatmul.mubr.f32.vlgmr.msra.gmra.mrb[0].mxu0 %v228_v7 }
 0x182   :  { %866 = vmatmul.mubr.f32.vlgmr.msra.gmra.mrb[0].mxu1 %v228_v7  ;;  %660 = vmatpush1.msra.mxu0 %v487_v8  ;;  %v2297_v7 = vpack.c.bf16 %v993_v4, %v991_v3  ;;  %v2299_v8 = vpack.c.bf16 %v998_v6, %v996_v5  ;;  %v1255_v3 = vld [vmem:[#allocation9 + $0x60] sm:$0xff]  ;;  %v1257_v4 = vld [vmem:[#allocation9 + $0x70] sm:$0xff]  ;;  %v1260_v5 = vld [vmem:[#allocation9 + $0x88] sm:$0xff] }
 0x183   :  { %723 = vmatprep.mubr.f32.mxu0 %v2938_v11  ;;  %873 = vmatpush1.msra.mxu1 %v489_v9  ;;  %v995_v9 = vld [vmem:[#allocation6 + $0x140] sm:$0xff] }
 0x184   :  { %936 = vmatprep.mubr.f32.mxu1 %v2938_v11  ;;  %2260 = vmatprep.subr.bf16.mxu0 %v2259_v10  ;;  %v997_v10 = vld [vmem:[#allocation6 + $0x150] sm:$0xff]  ;;  %v1262_v6 = vld [vmem:[#allocation9 + $0x98] sm:$0xff] }
 0x185   :  { %v2301_v14 = vpack.c.bf16 %v997_v10, %v995_v9  ;;  %v1259_v9 = vld [vmem:[#allocation9 + $0x80] sm:$0xff]  ;;  %v1261_v10 = vld [vmem:[#allocation9 + $0x90] sm:$0xff] }
 0x189   :  { %1806 = vmatmul.mubr.msk.f32.vlgmr.msra.gmra.mrb[0].mxu0 %vm513_vm0, %v230_v16 }
 0x18a   :  { %1807 = vmatmul.mubr.msk.f32.vlgmr.msra.gmra.mrb[0].mxu1 %vm513_vm0, %v230_v16  ;;  %2262 = vmatpush1.bf16.msra.mxu0 %v2261_v17  ;;  %v999_v16 = vld [vmem:[#allocation6 + $0x160] sm:$0xff]  ;;  %v1001_v17 = vld [vmem:[#allocation6 + $0x170] sm:$0xff] }
 0x18b   :  { %2264 = vmatprep.subr.bf16.mxu0 %v2263_v18  ;;  %v1004_v18 = vld [vmem:[#allocation6 + $0x188] sm:$0xff]  ;;  %v2305_v20 = vpack.c.bf16 %v1001_v17, %v999_v16  ;;  %v1265_v17 = vld [vmem:[#allocation9 + $0xb0] sm:$0xff] }
 0x18c   :  { %v2307_v21 = vpack.c.bf16 %v1006_v19, %v1004_v18  ;;  %v1263_v16 = vld [vmem:[#allocation9 + $0xa0] sm:$0xff]  ;;  %v1268_v18 = vld [vmem:[#allocation9 + $0xc8] sm:$0xff]  ;;  %v1270_v19 = vld [vmem:[#allocation9 + $0xd8] sm:$0xff] }
 0x18e   :  { %2266 = vmatpush1.bf16.msra.mxu0 %v2265_v23  ;;  %v1005_v23 = vld [vmem:[#allocation6 + $0x190] sm:$0xff] }
 0x18f   :  { %2268 = vmatprep.subr.bf16.mxu0 %v2267_v24  ;;  %v1008_v24 = vld [vmem:[#allocation6 + $0x1a8] sm:$0xff]  ;;  %v2309_v26 = vpack.c.bf16 %v1005_v23, %v1003_v22  ;;  %v1269_v23 = vld [vmem:[#allocation9 + $0xd0] sm:$0xff] }
 0x190   :  { %v2311_v27 = vpack.c.bf16 %v1010_v25, %v1008_v24  ;;  %v1267_v22 = vld [vmem:[#allocation9 + $0xc0] sm:$0xff]  ;;  %v1272_v24 = vld [vmem:[#allocation9 + $0xe8] sm:$0xff]  ;;  %v1274_v25 = vld [vmem:[#allocation9 + $0xf8] sm:$0xff] }
 0x192   :  { %2270 = vmatpush1.bf16.msra.mxu0 %v2269_v29  ;;  %v1009_v29 = vld [vmem:[#allocation6 + $0x1b0] sm:$0xff] }
 0x193   :  { %2272 = vmatprep.subr.bf16.mxu0 %v2271_v30  ;;  %v1012_v30 = vld [vmem:[#allocation6 + $0x1c8] sm:$0xff]  ;;  %v2313_v32 = vpack.c.bf16 %v1009_v29, %v1007_v28  ;;  %v1273_v29 = vld [vmem:[#allocation9 + $0xf0] sm:$0xff] }
 0x194   :  { %v2315_v33 = vpack.c.bf16 %v1014_v31, %v1012_v30  ;;  %v1271_v28 = vld [vmem:[#allocation9 + $0xe0] sm:$0xff]  ;;  %v1276_v30 = vld [vmem:[#allocation9 + $0x108] sm:$0xff]  ;;  %v1278_v31 = vld [vmem:[#allocation9 + $0x118] sm:$0xff] }
 0x196   :  { %2274 = vmatpush1.bf16.msra.mxu0 %v2273_v35  ;;  %v1013_v35 = vld [vmem:[#allocation6 + $0x1d0] sm:$0xff] }
 0x197   :  { %2276 = vmatprep.subr.bf16.mxu0 %v2275_v36  ;;  %v2317_v36 = vpack.c.bf16 %v1013_v35, %v1011_v34  ;;  %v1275_v34 = vld [vmem:[#allocation9 + $0x100] sm:$0xff]  ;;  %v1277_v35 = vld [vmem:[#allocation9 + $0x110] sm:$0xff] }
 0x198   :  { %v2421_v38 = vpack.c.bf16 %v1277_v35, %v1275_v34  ;;  %v1030_v34 = vld [vmem:[#allocation6 + $0x258] sm:$0xff] }
 0x19a   :  { %2278 = vmatpush1.bf16.msra.mxu0 %v2277_v41  ;;  %v1017_v41 = vld [vmem:[#allocation6 + $0x1f0] sm:$0xff] }
 0x19b   :  { %2280 = vmatprep.subr.bf16.mxu0 %v2279_v42  ;;  %v2321_v42 = vpack.c.bf16 %v1017_v41, %v1015_v40  ;;  %v1279_v40 = vld [vmem:[#allocation9 + $0x120] sm:$0xff]  ;;  %v1281_v41 = vld [vmem:[#allocation9 + $0x130] sm:$0xff] }
 0x19c   :  { %v2425_v44 = vpack.c.bf16 %v1281_v41, %v1279_v40  ;;  %v1032_v40 = vld [vmem:[#allocation6 + $0x268] sm:$0xff]  ;;  %v1034_v41 = vld [vmem:[#allocation6 + $0x278] sm:$0xff] }
 0x19e   :  { %2282 = vmatpush1.bf16.msra.mxu0 %v2281_v47  ;;  %v1246_v47 = vld [vmem:[#allocation9 + $0x18] sm:$0xff] }
 0x19f   :  { %2284 = vmatprep.subr.bf16.mxu0 %v2283_v48  ;;  %v1243_v48 = vld [vmem:[#allocation9] sm:$0xff]  ;;  %v2387_v49 = vpack.c.bf16 %v1246_v47, %v1244_v46  ;;  %v1285_v47 = vld [vmem:[#allocation9 + $0x150] sm:$0xff] }
 0x1a0   :  { %v1283_v46 = vld [vmem:[#allocation9 + $0x140] sm:$0xff] }
 0x1a1   :  { %2388 = vmatprep.subr.bf16.mxu1 %v2387_v49  ;;  %v1290_v49 = vld [vmem:[#allocation9 + $0x178] sm:$0xff] }
 0x1a2   :  { %2286 = vmatpush1.bf16.msra.mxu0 %v2285_v53  ;;  %v2389_v53 = vpack.c.bf16 %v1245_v50, %v1243_v48  ;;  %v1288_v48 = vld [vmem:[#allocation9 + $0x168] sm:$0xff]  ;;  %v2429_v50 = vpack.c.bf16 %v1285_v47, %v1283_v46  ;;  %v1038_v47 = vld [vmem:[#allocation6 + $0x298] sm:$0xff] }
 0x1a3   :  { %2288 = vmatprep.subr.bf16.mxu0 %v2287_v54  ;;  %v2391_v54 = vpack.c.bf16 %v1250_v52, %v1248_v51  ;;  %v493_v51 = vlaneseq  ;;  %v2431_v52 = vpack.c.bf16 %v1290_v49, %v1288_v48  ;;  %v1036_v46 = vld [vmem:[#allocation6 + $0x288] sm:$0xff] }
 0x1a4   :  { %2390 = vmatpush1.bf16.msra.mxu1 %v2389_v53  ;;  %v1287_v53 = vld [vmem:[#allocation9 + $0x160] sm:$0xff]  ;;  %v2339_v49 = vpack.c.bf16 %v1038_v47, %v1036_v46  ;;  %v1073_v47 = vld [vmem:[#allocation6 + $0x3b0] sm:$0xff] }
 0x1a5   :  { %2392 = vmatprep.subr.bf16.mxu1 %v2391_v54  ;;  %v1289_v54 = vld [vmem:[#allocation9 + $0x170] sm:$0xff]  ;;  %v1071_v46 = vld [vmem:[#allocation6 + $0x3a0] sm:$0xff] }
 0x1a6   :  { %2290 = vmatpush1.bf16.msra.mxu0 %v2289_v59  ;;  %v2393_v59 = vpack.c.bf16 %v1249_v56, %v1247_v55  ;;  %v1292_v55 = vld [vmem:[#allocation9 + $0x188] sm:$0xff]  ;;  %v1294_v56 = vld [vmem:[#allocation9 + $0x198] sm:$0xff] }
 0x1a7   :  { %2292 = vmatprep.subr.bf16.mxu0 %v2291_v60  ;;  %v2395_v60 = vpack.c.bf16 %v1254_v58, %v1252_v57  ;;  %v2433_v57 = vpack.c.bf16 %v1289_v54, %v1287_v53  ;;  %v3232_v58 = vshrl.u32 %v493_v51, 7  ;;  %v1037_v51 = vld [vmem:[#allocation6 + $0x290] sm:$0xff]  ;;  %v1042_v53 = vld [vmem:[#allocation6 + $0x2b8] sm:$0xff] }
 0x1a8   :  { %2394 = vmatpush1.bf16.msra.mxu1 %v2393_v59  ;;  %v2435_v59 = vpack.c.bf16 %v1294_v56, %v1292_v55  ;;  %v1039_v56 = vld [vmem:[#allocation6 + $0x2a0] sm:$0xff] }
 0x1a9   :  { %2396 = vmatprep.subr.bf16.mxu1 %v2395_v60  ;;  %v1291_v60 = vld [vmem:[#allocation9 + $0x180] sm:$0xff] }
 0x1aa   :  { %2294 = vmatpush1.bf16.msra.mxu0 %v2293_v1  ;;  %v2397_v1 = vpack.c.bf16 %v1253_v62, %v1251_v61  ;;  %v1293_v61 = vld [vmem:[#allocation9 + $0x190] sm:$0xff]  ;;  %v1296_v62 = vld [vmem:[#allocation9 + $0x1a8] sm:$0xff] }
 0x1ab   :  { %2296 = vmatprep.subr.bf16.mxu0 %v2295_v2  ;;  %v2399_v2 = vpack.c.bf16 %v1258_v0, %v1256_v63  ;;  %v1298_v63 = vld [vmem:[#allocation9 + $0x1b8] sm:$0xff]  ;;  %v2437_v0 = vpack.c.bf16 %v1293_v61, %v1291_v60 }
 0x1ac   :  { %2398 = vmatpush1.bf16.msra.mxu1 %v2397_v1  ;;  %v3235_v1 = vsub.s32 0, %v3232_v58  ;;  %v1046_v60 = vld [vmem:[#allocation6 + $0x2d8] sm:$0xff] }
 0x1ad   :  { %2400 = vmatprep.subr.bf16.mxu1 %v2399_v2  ;;  %v2439_v2 = vpack.c.bf16 %v1298_v63, %v1296_v62  ;;  %v1043_v63 = vld [vmem:[#allocation6 + $0x2c0] sm:$0xff] }
 0x1ae   :  { %2298 = vmatpush1.bf16.msra.mxu0 %v2297_v7  ;;  %v2401_v7 = vpack.c.bf16 %v1257_v4, %v1255_v3  ;;  %v1295_v3 = vld [vmem:[#allocation9 + $0x1a0] sm:$0xff]  ;;  %v1297_v4 = vld [vmem:[#allocation9 + $0x1b0] sm:$0xff] }
 0x1af   :  { %2300 = vmatprep.subr.bf16.mxu0 %v2299_v8  ;;  %v2403_v8 = vpack.c.bf16 %v1262_v6, %v1260_v5  ;;  %v3237_v5 = vld [vmem:[#allocation4] sm:$0xf]  ;;  %v3240_v6 = vsub.s32 1, %v3232_v58 }
 0x1b0   :  { %2402 = vmatpush1.bf16.msra.mxu1 %v2401_v7  ;;  %v507_v7 = vsub.s32 3, %v3232_v58 }
 0x1b1   :  { %2404 = vmatprep.subr.bf16.mxu1 %v2403_v8  ;;  %v2441_v8 = vpack.c.bf16 %v1297_v4, %v1295_v3  ;;  %v1050_v3 = vld [vmem:[#allocation6 + $0x2f8] sm:$0xff] }
 0x1b2   :  { %2302 = vmatpush1.bf16.msra.mxu0 %v2301_v14  ;;  %v2405_v14 = vpack.c.bf16 %v1261_v10, %v1259_v9  ;;  %v496_v9 = vrot.slane %v3237_v5, %v3235_v1  ;;  %v500_v10 = vrot.slane %v3237_v5, %v3240_v6 }
 0x1b3   :  { %2304 = vmatprep.subr.bf16.mxu0 %v2303_v15  ;;  %v2407_v15 = vpack.c.bf16 %v1266_v13, %v1264_v12  ;;  %v508_v12 = vrot.slane %v3237_v5, %v507_v7 }
 0x1b4   :  { %2406 = vmatpush1.bf16.msra.mxu1 %v2405_v14 }
 0x1b5   :  { %2408 = vmatprep.subr.bf16.mxu1 %v2407_v15 }
 0x1b6   :  { %2306 = vmatpush1.bf16.msra.mxu0 %v2305_v20  ;;  %v2409_v20 = vpack.c.bf16 %v1265_v17, %v1263_v16 }
 0x1b7   :  { %2308 = vmatprep.subr.bf16.mxu0 %v2307_v21  ;;  %v2411_v21 = vpack.c.bf16 %v1270_v19, %v1268_v18  ;;  %v1019_v19 = vld [vmem:[#allocation6 + $0x200] sm:$0xff] }
 0x1b8   :  { %2410 = vmatpush1.bf16.msra.mxu1 %v2409_v20  ;;  %v1021_v20 = vld [vmem:[#allocation6 + $0x210] sm:$0xff] }
 0x1b9   :  { %2412 = vmatprep.subr.bf16.mxu1 %v2411_v21 }
 0x1ba   :  { %2310 = vmatpush1.bf16.msra.mxu0 %v2309_v26  ;;  %v2413_v26 = vpack.c.bf16 %v1269_v23, %v1267_v22  ;;  %v1024_v23 = vld [vmem:[#allocation6 + $0x228] sm:$0xff] }
 0x1bb   :  { %2312 = vmatprep.subr.bf16.mxu0 %v2311_v27  ;;  %v2415_v27 = vpack.c.bf16 %v1274_v25, %v1272_v24  ;;  %v1026_v24 = vld [vmem:[#allocation6 + $0x238] sm:$0xff] }
 0x1bc   :  { %2414 = vmatpush1.bf16.msra.mxu1 %v2413_v26 }
 0x1bd   :  { %2416 = vmatprep.subr.bf16.mxu1 %v2415_v27  ;;  %v2325_v27 = vpack.c.bf16 %v1021_v20, %v1019_v19  ;;  %v1058_v19 = vld [vmem:[#allocation6 + $0x338] sm:$0xff] }
 0x1be   :  { %2314 = vmatpush1.bf16.msra.mxu0 %v2313_v32  ;;  %v2417_v32 = vpack.c.bf16 %v1273_v29, %v1271_v28  ;;  %v2327_v29 = vpack.c.bf16 %v1026_v24, %v1024_v23  ;;  %v1057_v23 = vld [vmem:[#allocation6 + $0x330] sm:$0xff]  ;;  %v1060_v24 = vld [vmem:[#allocation6 + $0x348] sm:$0xff] }
 0x1bf   :  { %2316 = vmatprep.subr.bf16.mxu0 %v2315_v33  ;;  %v2419_v33 = vpack.c.bf16 %v1278_v31, %v1276_v30  ;;  %v1023_v30 = vld [vmem:[#allocation6 + $0x220] sm:$0xff]  ;;  %v1025_v31 = vld [vmem:[#allocation6 + $0x230] sm:$0xff] }
 0x1c0   :  { %2418 = vmatpush1.bf16.msra.mxu1 %v2417_v32 }
 0x1c1   :  { %2420 = vmatprep.subr.bf16.mxu1 %v2419_v33  ;;  %v1028_v33 = vld [vmem:[#allocation6 + $0x248] sm:$0xff] }
 0x1c2   :  { %2318 = vmatpush1.bf16.msra.mxu0 %v2317_v36  ;;  %v1280_v36 = vld [vmem:[#allocation9 + $0x128] sm:$0xff] }
 0x1c3   :  { %2320 = vmatprep.subr.bf16.mxu0 %v2319_v39  ;;  %v2423_v39 = vpack.c.bf16 %v1282_v37, %v1280_v36  ;;  %v2329_v36 = vpack.c.bf16 %v1025_v31, %v1023_v30  ;;  %v2331_v37 = vpack.c.bf16 %v1030_v34, %v1028_v33  ;;  %v1064_v30 = vld [vmem:[#allocation6 + $0x368] sm:$0xff]  ;;  %v1066_v31 = vld [vmem:[#allocation6 + $0x378] sm:$0xff]  ;;  %v1063_v34 = vld [vmem:[#allocation6 + $0x360] sm:$0xff] }
 0x1c4   :  { %2422 = vmatpush1.bf16.msra.mxu1 %v2421_v38  ;;  %v1027_v38 = vld [vmem:[#allocation6 + $0x240] sm:$0xff]  ;;  %v2367_v33 = vpack.c.bf16 %v1066_v31, %v1064_v30  ;;  %v1414_v30 = vld [vmem:[#allocation12 + $0x90] sm:$0xff] }
 0x1c5   :  { %2424 = vmatprep.subr.bf16.mxu1 %v2423_v39  ;;  %v1029_v39 = vld [vmem:[#allocation6 + $0x250] sm:$0xff]  ;;  %v1415_v31 = vld [vmem:[#allocation12 + $0x98] sm:$0xff] }
 0x1c6   :  { %2322 = vmatpush1.bf16.msra.mxu0 %v2321_v42  ;;  %v1284_v42 = vld [vmem:[#allocation9 + $0x148] sm:$0xff] }
 0x1c7   :  { %2324 = vmatprep.subr.bf16.mxu0 %v2323_v45  ;;  %v2427_v45 = vpack.c.bf16 %v1286_v43, %v1284_v42  ;;  %v2333_v42 = vpack.c.bf16 %v1029_v39, %v1027_v38  ;;  %v2335_v43 = vpack.c.bf16 %v1034_v41, %v1032_v40  ;;  %v1067_v40 = vld [vmem:[#allocation6 + $0x380] sm:$0xff]  ;;  %v1069_v41 = vld [vmem:[#allocation6 + $0x390] sm:$0xff] }
 0x1c8   :  { %2426 = vmatpush1.bf16.msra.mxu1 %v2425_v44  ;;  %v1031_v44 = vld [vmem:[#allocation6 + $0x260] sm:$0xff] }
 0x1c9   :  { %2428 = vmatprep.subr.bf16.mxu1 %v2427_v45  ;;  %v1033_v45 = vld [vmem:[#allocation6 + $0x270] sm:$0xff] }
 0x1ca   :  { %v2337_v48 = vpack.c.bf16 %v1033_v45, %v1031_v44  ;;  %v2373_v44 = vpack.c.bf16 %v1069_v41, %v1067_v40  ;;  %v1417_v40 = vld [vmem:[#allocation12 + $0xa8] sm:$0xff] }
 0x1cc   :  { %2430 = vmatpush1.bf16.msra.mxu1 %v2429_v50  ;;  %v1035_v50 = vld [vmem:[#allocation6 + $0x280] sm:$0xff] }
 0x1cd   :  { %2432 = vmatprep.subr.bf16.mxu1 %v2431_v52  ;;  %v1040_v52 = vld [vmem:[#allocation6 + $0x2a8] sm:$0xff]  ;;  %v2341_v54 = vpack.c.bf16 %v1037_v51, %v1035_v50  ;;  %v1078_v50 = vld [vmem:[#allocation6 + $0x3d8] sm:$0xff]  ;;  %v2377_v51 = vpack.c.bf16 %v1073_v47, %v1071_v46 }
 0x1ce   :  { %v2343_v55 = vpack.c.bf16 %v1042_v53, %v1040_v52  ;;  %v1075_v53 = vld [vmem:[#allocation6 + $0x3c0] sm:$0xff] }
 0x1cf   :  { %v1419_v46 = vld [vmem:[#allocation12 + $0xb8] sm:$0xff] }
 0x1d0   :  { %2434 = vmatpush1.bf16.msra.mxu1 %v2433_v57  ;;  %v1041_v57 = vld [vmem:[#allocation6 + $0x2b0] sm:$0xff] }
 0x1d1   :  { %2436 = vmatprep.subr.bf16.mxu1 %v2435_v59  ;;  %v1044_v59 = vld [vmem:[#allocation6 + $0x2c8] sm:$0xff]  ;;  %v2345_v61 = vpack.c.bf16 %v1041_v57, %v1039_v56  ;;  %v1082_v57 = vld [vmem:[#allocation6 + $0x3f8] sm:$0xff] }
 0x1d2   :  { %v2347_v62 = vpack.c.bf16 %v1046_v60, %v1044_v59  ;;  %v1080_v56 = vld [vmem:[#allocation6 + $0x3e8] sm:$0xff] }
 0x1d3   :  { %v2383_v60 = vpack.c.bf16 %v1082_v57, %v1080_v56  ;;  %v1405_v56 = vld [vmem:[#allocation12 + $0x48] sm:$0xff]  ;;  %v1422_v57 = vld [vmem:[#allocation12 + $0xd0] sm:$0xff] }
 0x1d4   :  { %2438 = vmatpush1.bf16.msra.mxu1 %v2437_v0  ;;  %v1045_v0 = vld [vmem:[#allocation6 + $0x2d0] sm:$0xff] }
 0x1d5   :  { %2440 = vmatprep.subr.bf16.mxu1 %v2439_v2  ;;  %v1048_v2 = vld [vmem:[#allocation6 + $0x2e8] sm:$0xff]  ;;  %v2349_v4 = vpack.c.bf16 %v1045_v0, %v1043_v63 }
 0x1d6   :  { %v2351_v7 = vpack.c.bf16 %v1050_v3, %v1048_v2  ;;  %v1300_v3 = vld [vmem:[#allocation9 + $0x1c8] sm:$0xff] }
 0x1d8   :  { %2442 = vmatpush1.bf16.msra.mxu1 %v2441_v8  ;;  %v1047_v8 = vld [vmem:[#allocation6 + $0x2e0] sm:$0xff] }
 0x25c   :  { %v725_v13 = vpop.f32.mrb[0].mxu0 }
 0x25d   :  { %v2555_v14 = vadd.f32 %v725_v13, %v496_v9  ;;  %v3248_v15 = vpop.f32.mrb[0].mxu1  ;;  %v727_v16 = vpop.f32.mrb[1].mxu0  ;;  %v1049_v9 = vld [vmem:[#allocation6 + $0x2f0] sm:$0xff] }
 0x25e   :  { %v2556_v17 = vadd.f32 %v727_v16, %v500_v10  ;;  %v940_v18 = vpop.f32.mrb[1].mxu1  ;;  %v1052_v10 = vld [vmem:[#allocation6 + $0x308] sm:$0xff]  ;;  %v2353_v13 = vpack.c.bf16 %v1049_v9, %v1047_v8  ;;  %v1051_v16 = vld [vmem:[#allocation6 + $0x300] sm:$0xff]  ;;  %v1301_v8 = vld [vmem:[#allocation9 + $0x1d0] sm:$0xff] }
 0x25f   :  { %v947_v21 = vmul.f32 0.01, %v2555_v14  ;;  %v2558_v22 = vadd.f32 %v940_v18, %v508_v12  ;;  %vm943_vm1 = vcmp.gt.f32.partialorder %v2555_v14, 0.0  ;;  %v1054_v12 = vld [vmem:[#allocation6 + $0x318] sm:$0xff]  ;;  %v1056_v18 = vld [vmem:[#allocation6 + $0x328] sm:$0xff] }
 0x260   :  { %v948_v25 = vmul.f32 0.01, %v2556_v17  ;;  %vm944_vm2 = vcmp.gt.f32.partialorder %v2556_v17, 0.0 }
 0x261   :  { %v950_v26 = vmul.f32 0.01, %v2558_v22  ;;  %vm946_vm3 = vcmp.gt.f32.partialorder %v2558_v22, 0.0  ;;  %v951_v32 = vsel %vm943_vm1, %v2555_v14, %v947_v21  ;;  %v2355_v14 = vpack.c.bf16 %v1054_v12, %v1052_v10  ;;  %v1304_v10 = vld [vmem:[#allocation9 + $0x1e8] sm:$0xff]  ;;  %v1306_v12 = vld [vmem:[#allocation9 + $0x1f8] sm:$0xff] }
 0x262   :  { %v952_v28 = vsel %vm944_vm2, %v2556_v17, %v948_v25  ;;  %v1053_v17 = vld [vmem:[#allocation6 + $0x310] sm:$0xff]  ;;  %v2359_v21 = vpack.c.bf16 %v1058_v19, %v1056_v18  ;;  %v1062_v25 = vld [vmem:[#allocation6 + $0x358] sm:$0xff] }
 0x263   :  { %1159 = vmatprep.mubr.f32.mxu0 %v952_v28  ;;  %v954_v35 = vsel %vm946_vm3, %v2558_v22, %v950_v26  ;;  %v2357_v20 = vpack.c.bf16 %v1053_v17, %v1051_v16  ;;  %v1055_v22 = vld [vmem:[#allocation6 + $0x320] sm:$0xff]  ;;  %v1413_v18 = vld [vmem:[#allocation12 + $0x88] sm:$0xff] }
 0x264   :  { %1160 = vmatmul.mubr.f32.vlgmr.msra.gmra.mrb[2].mxu0 %v951_v32  ;;  %v2361_v26 = vpack.c.bf16 %v1057_v23, %v1055_v22  ;;  %v1059_v28 = vld [vmem:[#allocation6 + $0x340] sm:$0xff] }
 0x265   :  { %2326 = vmatpush1.bf16.msra.mxu0 %v2325_v27  ;;  %1230 = vmatprep.mubr.f32.mxu0 %v954_v35  ;;  %v2363_v27 = vpack.c.bf16 %v1062_v25, %v1060_v24  ;;  %v1065_v35 = vld [vmem:[#allocation6 + $0x370] sm:$0xff]  ;;  %v1412_v17 = vld [vmem:[#allocation12 + $0x80] sm:$0xff] }
 0x266   :  { %2328 = vmatprep.subr.bf16.mxu0 %v2327_v29  ;;  %v1061_v29 = vld [vmem:[#allocation6 + $0x350] sm:$0xff]  ;;  %v2369_v38 = vpack.c.bf16 %v1065_v35, %v1063_v34  ;;  %v2451_v19 = vpack.c.bf16 %v1413_v18, %v1412_v17  ;;  %v2455_v35 = vpack.c.bf16 %v1415_v31, %v1414_v30  ;;  %v1511_v30 = vld [vmem:[#allocation15 + $0x18] sm:$0xff] }
 0x267   :  { %v2365_v32 = vpack.c.bf16 %v1061_v29, %v1059_v28  ;;  %v1397_v28 = vld [vmem:[#allocation12 + $0x8] sm:$0xff] }
 0x269   :  { %2330 = vmatpush1.bf16.msra.mxu0 %v2329_v36  ;;  %v1068_v36 = vld [vmem:[#allocation6 + $0x388] sm:$0xff] }
 0x26a   :  { %2332 = vmatprep.subr.bf16.mxu0 %v2331_v37  ;;  %v1070_v37 = vld [vmem:[#allocation6 + $0x398] sm:$0xff] }
 0x26b   :  { %v2371_v39 = vpack.c.bf16 %v1070_v37, %v1068_v36  ;;  %v1398_v36 = vld [vmem:[#allocation12 + $0x10] sm:$0xff]  ;;  %v1399_v37 = vld [vmem:[#allocation12 + $0x18] sm:$0xff] }
 0x26c   :  { %v2457_v41 = vpack.c.bf16 %v1399_v37, %v1398_v36  ;;  %v1516_v37 = vld [vmem:[#allocation15 + $0x40] sm:$0xff] }
 0x26d   :  { %2334 = vmatpush1.bf16.msra.mxu0 %v2333_v42  ;;  %v1072_v42 = vld [vmem:[#allocation6 + $0x3a8] sm:$0xff] }
 0x26e   :  { %2336 = vmatprep.subr.bf16.mxu0 %v2335_v43  ;;  %v1074_v43 = vld [vmem:[#allocation6 + $0x3b8] sm:$0xff] }
 0x26f   :  { %v2375_v45 = vpack.c.bf16 %v1074_v43, %v1072_v42  ;;  %v1400_v43 = vld [vmem:[#allocation12 + $0x20] sm:$0xff] }
 0x271   :  { %2338 = vmatpush1.bf16.msra.mxu0 %v2337_v48  ;;  %v503_v48 = vsub.s32 2, %v3232_v58 }
 0x272   :  { %2340 = vmatprep.subr.bf16.mxu0 %v2339_v49  ;;  %v1076_v49 = vld [vmem:[#allocation6 + $0x3c8] sm:$0xff] }
 0x273   :  { %v2379_v52 = vpack.c.bf16 %v1078_v50, %v1076_v49  ;;  %v1402_v49 = vld [vmem:[#allocation12 + $0x30] sm:$0xff]  ;;  %v1403_v50 = vld [vmem:[#allocation12 + $0x38] sm:$0xff] }
 0x275   :  { %2342 = vmatpush1.bf16.msra.mxu0 %v2341_v54  ;;  %v1077_v54 = vld [vmem:[#allocation6 + $0x3d0] sm:$0xff] }
 0x276   :  { %2344 = vmatprep.subr.bf16.mxu0 %v2343_v55  ;;  %v504_v55 = vrot.slane %v3237_v5, %v503_v48  ;;  %v2381_v59 = vpack.c.bf16 %v1077_v54, %v1075_v53  ;;  %v1302_v5 = vld [vmem:[#allocation9 + $0x1d8] sm:$0xff]  ;;  %v2465_v53 = vpack.c.bf16 %v1403_v50, %v1402_v49  ;;  %v1604_v49 = vld [vmem:[#allocation18] sm:$0xff]  ;;  %v1605_v50 = vld [vmem:[#allocation18 + $0x8] sm:$0xff] }
 0x278   :  { %v2557_v58 = vadd.f32 %v3248_v15, %v504_v55  ;;  %v1303_v15 = vld [vmem:[#allocation9 + $0x1e0] sm:$0xff] }
 0x279   :  { %2346 = vmatpush1.bf16.msra.mxu0 %v2345_v61  ;;  %v1079_v61 = vld [vmem:[#allocation6 + $0x3e0] sm:$0xff] }
 0x27a   :  { %2348 = vmatprep.subr.bf16.mxu0 %v2347_v62  ;;  %v1081_v62 = vld [vmem:[#allocation6 + $0x3f0] sm:$0xff]  ;;  %v949_v0 = vmul.f32 0.01, %v2557_v58  ;;  %vm945_vm4 = vcmp.gt.f32.partialorder %v2557_v58, 0.0  ;;  %v1404_v55 = vld [vmem:[#allocation12 + $0x40] sm:$0xff] }
 0x27b   :  { %v2385_v63 = vpack.c.bf16 %v1081_v62, %v1079_v61  ;;  %v1406_v62 = vld [vmem:[#allocation12 + $0x50] sm:$0xff] }
 0x27c   :  { %v953_v2 = vsel %vm945_vm4, %v2557_v58, %v949_v0  ;;  %v1407_v58 = vld [vmem:[#allocation12 + $0x58] sm:$0xff]  ;;  %v1424_v0 = vld [vmem:[#allocation12 + $0xe0] sm:$0xff] }
 0x27d   :  { %2350 = vmatpush1.bf16.msra.mxu0 %v2349_v4  ;;  %v2443_v4 = vpack.c.bf16 %v1302_v5, %v1300_v3  ;;  %v1408_v5 = vld [vmem:[#allocation12 + $0x60] sm:$0xff] }
 0x27e   :  { %2352 = vmatprep.subr.bf16.mxu0 %v2351_v7  ;;  %v1299_v7 = vld [vmem:[#allocation9 + $0x1c0] sm:$0xff] }
 0x27f   :  { %v2445_v9 = vpack.c.bf16 %v1301_v8, %v1299_v7  ;;  %2444 = vmatprep.subr.bf16.mxu1 %v2443_v4  ;;  %v1409_v4 = vld [vmem:[#allocation12 + $0x68] sm:$0xff]  ;;  %v1426_v8 = vld [vmem:[#allocation12 + $0xf0] sm:$0xff] }
 0x280   :  { %v2477_v7 = vpack.c.bf16 %v1409_v4, %v1408_v5  ;;  %v1616_v5 = vld [vmem:[#allocation18 + $0x60] sm:$0xff]  ;;  %v1617_v4 = vld [vmem:[#allocation18 + $0x68] sm:$0xff] }
 0x281   :  { %2354 = vmatpush1.bf16.msra.mxu0 %v2353_v13  ;;  %2446 = vmatpush1.bf16.msra.mxu1 %v2445_v9  ;;  %v2447_v13 = vpack.c.bf16 %v1306_v12, %v1304_v10  ;;  %v1427_v9 = vld [vmem:[#allocation12 + $0xf8] sm:$0xff]  ;;  %v1410_v12 = vld [vmem:[#allocation12 + $0x70] sm:$0xff] }
 0x282   :  { %2356 = vmatprep.subr.bf16.mxu0 %v2355_v14  ;;  %v1305_v14 = vld [vmem:[#allocation9 + $0x1f0] sm:$0xff]  ;;  %v2479_v10 = vpack.c.bf16 %v1427_v9, %v1426_v8  ;;  %v1808_v9 = vld [vmem:[#allocation13] ss:$0 sm:$0xff] }
 0x283   :  { %v2449_v16 = vpack.c.bf16 %v1305_v14, %v1303_v15  ;;  %2448 = vmatprep.subr.bf16.mxu1 %v2447_v13  ;;  %v1411_v13 = vld [vmem:[#allocation12 + $0x78] sm:$0xff]  ;;  %v2939_v14 = vmov 0.0|0.0  }
 0x284   :  { %v2481_v15 = vpack.c.bf16 %v1411_v13, %v1410_v12 }
 0x285   :  { %2358 = vmatpush1.bf16.msra.mxu0 %v2357_v20  ;;  %2450 = vmatpush1.bf16.msra.mxu1 %v2449_v16  ;;  %v1083_v20 = vld [vmem:[#allocation7] sm:$0x3]  ;;  %v1307_v16 = vld [vmem:[#allocation10] sm:$0x3] }
 0x286   :  { %2360 = vmatprep.subr.bf16.mxu0 %v2359_v21  ;;  %2452 = vmatprep.subr.bf16.mxu1 %v2451_v19  ;;  %v1088_v21 = vrot.slane %v1083_v20, %v3235_v1  ;;  %v1092_v22 = vrot.slane %v1083_v20, %v3240_v6  ;;  %v1312_v17 = vrot.slane %v1307_v16, %v3235_v1 }
 0x287   :  { %v1316_v18 = vrot.slane %v1307_v16, %v3240_v6  ;;  %v1512_v6 = vld [vmem:[#allocation15 + $0x20] sm:$0xff] }
 0x289   :  { %2362 = vmatpush1.bf16.msra.mxu0 %v2361_v26 }
 0x28a   :  { %2364 = vmatprep.subr.bf16.mxu0 %v2363_v27  ;;  %v1396_v27 = vld [vmem:[#allocation12] sm:$0xff] }
 0x28d   :  { %2366 = vmatpush1.bf16.msra.mxu0 %v2365_v32 }
 0x28e   :  { %2368 = vmatprep.subr.bf16.mxu0 %v2367_v33  ;;  %v2453_v33 = vpack.c.bf16 %v1397_v28, %v1396_v27 }
 0x291   :  { %2370 = vmatpush1.bf16.msra.mxu0 %v2369_v38 }
 0x292   :  { %2372 = vmatprep.subr.bf16.mxu0 %v2371_v39  ;;  %v1416_v39 = vld [vmem:[#allocation12 + $0xa0] sm:$0xff] }
 0x293   :  { %v2459_v42 = vpack.c.bf16 %v1417_v40, %v1416_v39  ;;  %v1518_v40 = vld [vmem:[#allocation15 + $0x50] sm:$0xff] }
 0x295   :  { %2374 = vmatpush1.bf16.msra.mxu0 %v2373_v44  ;;  %v1401_v44 = vld [vmem:[#allocation12 + $0x28] sm:$0xff] }
 0x296   :  { %2376 = vmatprep.subr.bf16.mxu0 %v2375_v45  ;;  %v1418_v45 = vld [vmem:[#allocation12 + $0xb0] sm:$0xff]  ;;  %v2461_v47 = vpack.c.bf16 %v1401_v44, %v1400_v43  ;;  %v1520_v43 = vld [vmem:[#allocation15 + $0x60] sm:$0xff] }
 0x297   :  { %v2463_v48 = vpack.c.bf16 %v1419_v46, %v1418_v45  ;;  %v1521_v44 = vld [vmem:[#allocation15 + $0x68] sm:$0xff]  ;;  %v1522_v46 = vld [vmem:[#allocation15 + $0x70] sm:$0xff] }
 0x298   :  { %v2502_v45 = vpack.c.bf16 %v1521_v44, %v1520_v43  ;;  %v1714_v44 = vld [vmem:[#allocation21 + $0x70] sm:$0xff] }
 0x299   :  { %2378 = vmatpush1.bf16.msra.mxu0 %v2377_v51  ;;  %v1420_v51 = vld [vmem:[#allocation12 + $0xc0] sm:$0xff] }
 0x29a   :  { %2380 = vmatprep.subr.bf16.mxu0 %v2379_v52  ;;  %v1421_v52 = vld [vmem:[#allocation12 + $0xc8] sm:$0xff] }
 0x29b   :  { %v2467_v54 = vpack.c.bf16 %v1421_v52, %v1420_v51  ;;  %v1606_v51 = vld [vmem:[#allocation18 + $0x10] sm:$0xff]  ;;  %v2508_v52 = vpack.c.bf16 %v1605_v50, %v1604_v49 }
 0x29d   :  { %2382 = vmatpush1.bf16.msra.mxu0 %v2381_v59  ;;  %v1423_v59 = vld [vmem:[#allocation12 + $0xd8] sm:$0xff] }
 0x29e   :  { %2384 = vmatprep.subr.bf16.mxu0 %v2383_v60  ;;  %v2469_v60 = vpack.c.bf16 %v1405_v56, %v1404_v55  ;;  %v2471_v61 = vpack.c.bf16 %v1423_v59, %v1422_v57  ;;  %v1608_v55 = vld [vmem:[#allocation18 + $0x20] sm:$0xff]  ;;  %v1609_v56 = vld [vmem:[#allocation18 + $0x28] sm:$0xff]  ;;  %v1610_v59 = vld [vmem:[#allocation18 + $0x30] sm:$0xff] }
 0x29f   :  { %v2514_v57 = vpack.c.bf16 %v1609_v56, %v1608_v55 }
 0x2a1   :  { %2386 = vmatpush1.bf16.msra.mxu0 %v2385_v63  ;;  %v2473_v63 = vpack.c.bf16 %v1407_v58, %v1406_v62  ;;  %v1612_v62 = vld [vmem:[#allocation18 + $0x40] sm:$0xff]  ;;  %v1613_v58 = vld [vmem:[#allocation18 + $0x48] sm:$0xff] }
 0x2a2   :  { %2507 = vmatprep.subr.bf16.mxu0 %v2939_v14 }
 0x2a4   :  { %1231 = vmatmul.mubr.f32.vlgmr.msra.gmra.mrb[2].mxu0 %v953_v2  ;;  %v1425_v2 = vld [vmem:[#allocation12 + $0xe8] sm:$0xff] }
 0x2a5   :  { %v2475_v3 = vpack.c.bf16 %v1425_v2, %v1424_v0  ;;  %1965 = vmatprep.mubr.msk.f32.mxu0 %vm2940_vm9, %v2938_v11  ;;  %2509 = vmatpush3.bf16.msra.mxu0 %v2508_v52  ;;  %v1614_v0 = vld [vmem:[#allocation18 + $0x50] sm:$0xff]  ;;  %v1615_v2 = vld [vmem:[#allocation18 + $0x58] sm:$0xff] }
 0x2a6   :  { %2510 = vmatprep.subr.bf16.mxu0 %v2939_v14 }
 0x377   :  { %v1232_v23 = vpop.f32.mrb[2].mxu0 }
 0x378   :  { %v2559_v24 = vadd.f32 %v1232_v23, %v1088_v21  ;;  %v1234_v25 = vpop.f32.mrb[3].mxu0  ;;  %v1508_v23 = vld [vmem:[#allocation15] sm:$0xff] }
 0x379   :  { %v2560_v26 = vadd.f32 %v1234_v25, %v1092_v22 }
 0x37a   :  { %v1239_v29 = vmul.f32 0.01, %v2559_v24  ;;  %vm1237_vm5 = vcmp.gt.f32.partialorder %v2559_v24, 0.0 }
 0x37b   :  { %v1240_v32 = vmul.f32 0.01, %v2560_v26  ;;  %vm1238_vm6 = vcmp.gt.f32.partialorder %v2560_v26, 0.0 }
 0x37c   :  { %v1241_v38 = vsel %vm1237_vm5, %v2559_v24, %v1239_v29  ;;  %v1509_v24 = vld [vmem:[#allocation15 + $0x8] sm:$0xff]  ;;  %v1510_v29 = vld [vmem:[#allocation15 + $0x10] sm:$0xff] }
 0x37d   :  { %v1242_v34 = vsel %vm1238_vm6, %v2560_v26, %v1240_v32  ;;  %v2484_v27 = vpack.c.bf16 %v1509_v24, %v1508_v23  ;;  %v2487_v1 = vpack.c.bf16 %v1511_v30, %v1510_v29  ;;  %v1513_v32 = vld [vmem:[#allocation15 + $0x28] sm:$0xff]  ;;  %v1703_v24 = vld [vmem:[#allocation21 + $0x18] sm:$0xff] }
 0x37e   :  { %1383 = vmatprep.mubr.f32.mxu1 %v1242_v34  ;;  %v1514_v34 = vld [vmem:[#allocation15 + $0x30] sm:$0xff]  ;;  %v1707_v29 = vld [vmem:[#allocation21 + $0x38] sm:$0xff] }
 0x37f   :  { %1384 = vmatmul.mubr.f32.vlgmr.msra.gmra.mrb[2].mxu1 %v1241_v38  ;;  %v1517_v38 = vld [vmem:[#allocation15 + $0x48] sm:$0xff] }
 0x380   :  { %2454 = vmatpush3.bf16.msra.mxu1 %v2453_v33  ;;  %v2490_v33 = vpack.c.bf16 %v1513_v32, %v1512_v6  ;;  %v2496_v39 = vpack.c.bf16 %v1517_v38, %v1516_v37  ;;  %v1710_v32 = vld [vmem:[#allocation21 + $0x50] sm:$0xff]  ;;  %v1809_v38 = vld [vmem:[#allocation16] ss:$0 sm:$0xff] }
 0x381   :  { %2456 = vmatprep.subr.bf16.mxu1 %v2455_v35  ;;  %v1515_v35 = vld [vmem:[#allocation15 + $0x38] sm:$0xff] }
 0x382   :  { %v2493_v36 = vpack.c.bf16 %v1515_v35, %v1514_v34  ;;  %v1712_v35 = vld [vmem:[#allocation21 + $0x60] sm:$0xff] }
 0x384   :  { %2458 = vmatpush3.bf16.msra.mxu1 %v2457_v41  ;;  %v1519_v41 = vld [vmem:[#allocation15 + $0x58] sm:$0xff] }
 0x385   :  { %2460 = vmatprep.subr.bf16.mxu1 %v2459_v42  ;;  %v2499_v42 = vpack.c.bf16 %v1519_v41, %v1518_v40 }
 0x388   :  { %2462 = vmatpush3.bf16.msra.mxu1 %v2461_v47  ;;  %v1523_v47 = vld [vmem:[#allocation15 + $0x78] sm:$0xff] }
 0x389   :  { %2464 = vmatprep.subr.bf16.mxu1 %v2463_v48  ;;  %v2505_v48 = vpack.c.bf16 %v1523_v47, %v1522_v46  ;;  %v1810_v47 = vld [vmem:[#allocation19] ss:$0 sm:$0xff] }
 0x38c   :  { %2466 = vmatpush3.bf16.msra.mxu1 %v2465_v53  ;;  %v1607_v53 = vld [vmem:[#allocation18 + $0x18] sm:$0xff] }
 0x38d   :  { %2468 = vmatprep.subr.bf16.mxu1 %v2467_v54  ;;  %v2511_v54 = vpack.c.bf16 %v1607_v53, %v1606_v51 }
 0x38f   :  { %2512 = vmatpush3.bf16.msra.mxu0 %v2511_v54 }
 0x390   :  { %2470 = vmatpush3.bf16.msra.mxu1 %v2469_v60  ;;  %2513 = vmatprep.subr.bf16.mxu0 %v2939_v14  ;;  %v1611_v60 = vld [vmem:[#allocation18 + $0x38] sm:$0xff] }
 0x391   :  { %2472 = vmatprep.subr.bf16.mxu1 %v2471_v61  ;;  %v2517_v61 = vpack.c.bf16 %v1611_v60, %v1610_v59 }
 0x393   :  { %2515 = vmatpush3.bf16.msra.mxu0 %v2514_v57 }
 0x394   :  { %2474 = vmatpush3.bf16.msra.mxu1 %v2473_v63  ;;  %2516 = vmatprep.subr.bf16.mxu0 %v2939_v14  ;;  %v2520_v63 = vpack.c.bf16 %v1613_v58, %v1612_v62 }
 0x395   :  { %2476 = vmatprep.subr.bf16.mxu1 %v2475_v3  ;;  %v2523_v3 = vpack.c.bf16 %v1615_v2, %v1614_v0 }
 0x397   :  { %2518 = vmatpush3.bf16.msra.mxu0 %v2517_v61 }
 0x398   :  { %2478 = vmatpush3.bf16.msra.mxu1 %v2477_v7  ;;  %2519 = vmatprep.subr.bf16.mxu0 %v2939_v14  ;;  %v2526_v7 = vpack.c.bf16 %v1617_v4, %v1616_v5 }
 0x399   :  { %2480 = vmatprep.subr.bf16.mxu1 %v2479_v10 }
 0x39b   :  { %2521 = vmatpush3.bf16.msra.mxu0 %v2520_v63 }
 0x39c   :  { %2482 = vmatpush3.bf16.msra.mxu1 %v2481_v15  ;;  %2522 = vmatprep.subr.bf16.mxu0 %v2939_v14 }
 0x39d   :  { %2483 = vmatprep.subr.bf16.mxu1 %v2939_v14 }
 0x39f   :  { %2524 = vmatpush3.bf16.msra.mxu0 %v2523_v3 }
 0x3a0   :  { %2525 = vmatprep.subr.bf16.mxu0 %v2939_v14 }
 0x3a3   :  { %2527 = vmatpush3.bf16.msra.mxu0 %v2526_v7 }
 0x3a4   :  { %2528 = vmatprep.subr.bf16.mxu0 %v2939_v14 }
 0x452   :  { %v1385_v19 = vpop.f32.mrb[2].mxu1 }
 0x453   :  { %v1386_v20 = vadd.f32 %v1385_v19, %v1312_v17  ;;  %v1387_v21 = vpop.f32.mrb[3].mxu1  ;;  %v1618_v17 = vld [vmem:[#allocation18 + $0x70] sm:$0xff] }
 0x454   :  { %v1388_v22 = vadd.f32 %v1387_v21, %v1316_v18  ;;  %v1619_v18 = vld [vmem:[#allocation18 + $0x78] sm:$0xff]  ;;  %v1701_v21 = vld [vmem:[#allocation21 + $0x8] sm:$0xff] }
 0x455   :  { %v1392_v25 = vmul.f32 0.01, %v1386_v20  ;;  %vm1390_vm7 = vcmp.gt.f32.partialorder %v1386_v20, 0.0  ;;  %v2529_v19 = vpack.c.bf16 %v1619_v18, %v1618_v17 }
 0x456   :  { %v1393_v26 = vmul.f32 0.01, %v1388_v22  ;;  %vm1391_vm8 = vcmp.gt.f32.partialorder %v1388_v22, 0.0 }
 0x457   :  { %v1394_v31 = vsel %vm1390_vm7, %v1386_v20, %v1392_v25  ;;  %2530 = vmatpush3.bf16.msra.mxu0 %v2529_v19  ;;  %v1700_v20 = vld [vmem:[#allocation21] sm:$0xff] }
 0x458   :  { %v1395_v28 = vsel %vm1391_vm8, %v1388_v22, %v1393_v26  ;;  %v1702_v22 = vld [vmem:[#allocation21 + $0x10] sm:$0xff]  ;;  %v2532_v23 = vpack.c.bf16 %v1701_v21, %v1700_v20  ;;  %v1704_v26 = vld [vmem:[#allocation21 + $0x20] sm:$0xff] }
 0x459   :  { %1499 = vmatprep.mubr.f32.mxu1 %v1395_v28  ;;  %v2535_v25 = vpack.c.bf16 %v1703_v24, %v1702_v22 }
 0x45a   :  { %1500 = vmatmul.mubr.f32.vlgmr.msra.gmra.mrb[4].mxu1 %v1394_v31  ;;  %v1708_v31 = vld [vmem:[#allocation21 + $0x40] sm:$0xff] }
 0x45b   :  { %2485 = vmatpush3.bf16.msra.mxu1 %v2484_v27  ;;  %1930 = vmatprep.mubr.msk.f32.mxu1 %vm2940_vm9, %v2938_v11  ;;  %v1705_v27 = vld [vmem:[#allocation21 + $0x28] sm:$0xff] }
 0x45c   :  { %2486 = vmatprep.subr.bf16.mxu1 %v2939_v14  ;;  %v2538_v28 = vpack.c.bf16 %v1705_v27, %v1704_v26 }
 0x45f   :  { %2488 = vmatpush3.bf16.msra.mxu1 %v2487_v1  ;;  %v1709_v1 = vld [vmem:[#allocation21 + $0x48] sm:$0xff] }
 0x460   :  { %2489 = vmatprep.subr.bf16.mxu1 %v2939_v14  ;;  %v2544_v6 = vpack.c.bf16 %v1709_v1, %v1708_v31 }
 0x463   :  { %2491 = vmatpush3.bf16.msra.mxu1 %v2490_v33  ;;  %v1711_v33 = vld [vmem:[#allocation21 + $0x58] sm:$0xff] }
 0x464   :  { %2492 = vmatprep.subr.bf16.mxu1 %v2939_v14  ;;  %v2547_v34 = vpack.c.bf16 %v1711_v33, %v1710_v32 }
 0x467   :  { %2494 = vmatpush3.bf16.msra.mxu1 %v2493_v36  ;;  %v1713_v36 = vld [vmem:[#allocation21 + $0x68] sm:$0xff] }
 0x468   :  { %2495 = vmatprep.subr.bf16.mxu1 %v2939_v14  ;;  %v2550_v37 = vpack.c.bf16 %v1713_v36, %v1712_v35 }
 0x46b   :  { %2497 = vmatpush3.bf16.msra.mxu1 %v2496_v39 }
 0x46c   :  { %2498 = vmatprep.subr.bf16.mxu1 %v2939_v14 }
 0x46f   :  { %2500 = vmatpush3.bf16.msra.mxu1 %v2499_v42 }
 0x470   :  { %2501 = vmatprep.subr.bf16.mxu1 %v2939_v14 }
 0x473   :  { %2503 = vmatpush3.bf16.msra.mxu1 %v2502_v45  ;;  %v1715_v45 = vld [vmem:[#allocation21 + $0x78] sm:$0xff] }
 0x474   :  { %2504 = vmatprep.subr.bf16.mxu1 %v2939_v14  ;;  %v2553_v46 = vpack.c.bf16 %v1715_v45, %v1714_v44 }
 0x477   :  { %2506 = vmatpush3.bf16.msra.mxu1 %v2505_v48 }
 0x478   :  { %2531 = vmatprep.subr.bf16.mxu1 %v2939_v14 }
 0x52d   :  { %v1844_v8 = vpop.f32.mrb[4].mxu1 }
 0x52e   :  { %v1845_v10 = vpop.f32.mrb[5].mxu1 }
 0x52f   :  { %v1846_v12 = vadd.f32 %v1845_v10, %v1844_v8 }
 0x531   :  { %v1502_v13 = vadd.f32 %v1846_v12, %v1808_v9 }
 0x533   :  { %v1506_v15 = vmul.f32 0.01, %v1502_v13  ;;  %vm1505_vm10 = vcmp.gt.f32.partialorder %v1502_v13, 0.0 }
 0x535   :  { %v1507_v16 = vsel %vm1505_vm10, %v1502_v13, %v1506_v15 }
 0x536   :  { %1931 = vmatmul.mubr.f32.vlgmr.msra.gmra.mrb[6].mxu1 %v1507_v16 }
 0x537   :  { %2000 = vmatprep.mubr.msk.f32.mxu1 %vm2940_vm9, %v2938_v11  ;;  %2533 = vmatpush3.bf16.msra.mxu1 %v2532_v23  ;;  %v1706_v11 = vld [vmem:[#allocation21 + $0x30] sm:$0xff] }
 0x538   :  { %2534 = vmatprep.subr.bf16.mxu1 %v2939_v14  ;;  %v2541_v30 = vpack.c.bf16 %v1707_v29, %v1706_v11 }
 0x53b   :  { %2536 = vmatpush3.bf16.msra.mxu1 %v2535_v25 }
 0x53c   :  { %2537 = vmatprep.subr.bf16.mxu1 %v2939_v14 }
 0x53f   :  { %2539 = vmatpush3.bf16.msra.mxu1 %v2538_v28 }
 0x540   :  { %2540 = vmatprep.subr.bf16.mxu1 %v2939_v14 }
 0x543   :  { %2542 = vmatpush3.bf16.msra.mxu1 %v2541_v30 }
 0x544   :  { %2543 = vmatprep.subr.bf16.mxu1 %v2939_v14 }
 0x547   :  { %2545 = vmatpush3.bf16.msra.mxu1 %v2544_v6 }
 0x548   :  { %2546 = vmatprep.subr.bf16.mxu1 %v2939_v14 }
 0x54b   :  { %2548 = vmatpush3.bf16.msra.mxu1 %v2547_v34 }
 0x54c   :  { %2549 = vmatprep.subr.bf16.mxu1 %v2939_v14 }
 0x54f   :  { %2551 = vmatpush3.bf16.msra.mxu1 %v2550_v37 }
 0x550   :  { %2552 = vmatprep.subr.bf16.mxu1 %v2939_v14  ;;  %v1811_v14 = vld [vmem:[#allocation22] ss:$0 sm:$0xff] }
 0x553   :  { %2554 = vmatpush3.bf16.msra.mxu1 %v2553_v46 }
 0x609   :  { %v1597_v39 = vpop.f32.mrb[6].mxu1 }
 0x60a   :  { %v1598_v40 = vadd.f32 %v1809_v38, %v1597_v39  ;;  %v1932_v41 = vpop.f32.mrb[7].mxu1 }
 0x60c   :  { %vm1601_vm11 = vcmp.gt.f32.partialorder %v1598_v40, 0.0  ;;  %v1602_v42 = vmul.f32 0.01, %v1598_v40 }
 0x60e   :  { %v1603_v43 = vsel %vm1601_vm11, %v1598_v40, %v1602_v42 }
 0x60f   :  { %1966 = vmatmul.mubr.f32.vlgmr.msra.gmra.mrb[4].mxu0 %v1603_v43 }
 0x6e2   :  { %v1693_v48 = vpop.f32.mrb[4].mxu0 }
 0x6e3   :  { %v1694_v49 = vadd.f32 %v1810_v47, %v1693_v48  ;;  %v1967_v50 = vpop.f32.mrb[5].mxu0 }
 0x6e5   :  { %vm1697_vm12 = vcmp.gt.f32.partialorder %v1694_v49, 0.0  ;;  %v1698_v51 = vmul.f32 0.01, %v1694_v49 }
 0x6e7   :  { %v1699_v52 = vsel %vm1697_vm12, %v1694_v49, %v1698_v51 }
 0x6e8   :  { %2001 = vmatmul.mubr.f32.vlgmr.msra.gmra.mrb[8].mxu1 %v1699_v52 }
 0x7bb   :  { %v1789_v53 = vpop.f32.mrb[8].mxu1 }
 0x7bc   :  { %v1790_v54 = vadd.f32 %v1811_v14, %v1789_v53  ;;  %v2002_v55 = vpop.f32.mrb[9].mxu1 }
 0x7be   :  { %1793 = vst [vmem:[%s3305_s15] sm:$0xff] %v1790_v54 }
 0x7bf   :  { %1798 = vsyncpa [#allocation3], 1 }
 0x7c0   :  { %1799 = vsyncpa [#allocation5], 1 }
 0x7c1   :  { %1800 = vsyncpa [#allocation8], 1 }
 0x7c2   :  { %1801 = vsyncpa [#allocation11], 1 }
 0x7c3   :  { %1802 = vsyncpa [#allocation14], 1 }
 0x7c4   :  { %1803 = vsyncpa [#allocation17], 1 }
 0x7c5   :  { %1804 = vsyncpa [#allocation20], 1 }
 0x7c6   :  { %1805 = vsyncpa [#allocation23], 1 }

</bundles_post_ra>
